<compile_context>
chip_gen: v5e
topology: v5e:2x2
jax: 0.10.0
libtpu: 0.0.40
codegen_flags: <defaults>
</compile_context>

<pallas_src>
import math
from functools import partial

import jax
import jax.numpy as jnp
from jax.experimental import pallas as pl
from jax.experimental.pallas import tpu as pltpu

BN_EPS = 1e-5
WHITEN_EPS = 1e-5     # eps*I added to the group covariance before inverse-sqrt
NS_ITERS = 10         # Newton-Schulz iterations for cov^{-1/2}


def _pick_tile(dim, target):
    """Use `target` if it evenly divides `dim`, else fall back to the full dim."""
    return target if (dim >= target and dim % target == 0) else dim


def _outer_parallel():
    """CORE_PARALLEL on v7x (2 TensorCores/chip); plain PARALLEL elsewhere."""
    try:
        kind = jax.devices()[0].device_kind.lower()
    except Exception:
        kind = ""
    if "v7" in kind:
        return getattr(pltpu, "CORE_PARALLEL", pltpu.PARALLEL)
    return pltpu.PARALLEL


# ----------------------------------------------------------------------------
# Kernel 1: fused Linear + BatchNorm1d (train-mode batch stats) + optional ReLU
#   grid = (Dout // tn, Din // tk); K (reduction) axis last / "arbitrary".
#   x is resident (constant-index block) and sliced per K step in VMEM.
# ----------------------------------------------------------------------------
def _linear_bn_kernel(x_ref, w_ref, b_ref, gamma_ref, beta_ref, o_ref, acc_ref,
                      *, relu, tk):
    k = pl.program_id(1)

    @pl.when(k == 0)
    def _():
        acc_ref[...] = jnp.zeros_like(acc_ref)

    # x_ref holds the full (N, Din) bf16 activations for the whole grid; slice
    # the current K chunk locally instead of re-fetching it per Dout tile.
    k_start = pl.multiple_of(k * tk, tk)
    acc_ref[...] += jnp.dot(
        x_ref[:, pl.ds(k_start, tk)],           # bf16 (cast once, outside)
        w_ref[...],                             # bf16 (cast once, outside)
        preferred_element_type=jnp.float32,
    )

    @pl.when(k == pl.num_programs(1) - 1)
    def _():
        y = acc_ref[...] + b_ref[...]                         # (N, tn), f32
        # BatchNorm1d in train mode: biased batch variance, f32 stats.
        mean = jnp.mean(y, axis=0, keepdims=True)
        var = jnp.mean(jnp.square(y - mean), axis=0, keepdims=True)
        out = (y - mean) * jax.lax.rsqrt(var + BN_EPS)
        out = out * gamma_ref[...] + beta_ref[...]
        if relu:
            out = jnp.maximum(out, 0.0)
        o_ref[...] = out.astype(o_ref.dtype)


def linear_bn(x, w, b, gamma, beta, *, relu, out_dtype=jnp.float32,
              tn_target=1024, tk_target=1024):
    N, Din = x.shape
    Dout = w.shape[1]
    tn = _pick_tile(Dout, tn_target)
    tk = _pick_tile(Din, tk_target)
    grid = (Dout // tn, Din // tk)

    # VMEM budget: resident x + double-buffered weight/output blocks + f32 acc.
    est = (N * Din * x.dtype.itemsize
           + 2 * tk * tn * w.dtype.itemsize
           + N * tn * 4
           + 2 * N * tn * jnp.dtype(out_dtype).itemsize
           + 8 * tn * 4)
    vmem_limit = int(min(48 * 2 ** 20, max(32 * 2 ** 20, 1.5 * est)))

    return pl.pallas_call(
        partial(_linear_bn_kernel, relu=relu, tk=tk),
        grid=grid,
        in_specs=[
            pl.BlockSpec((N, Din), lambda j, k: (0, 0)),      # x: resident, DMA'd once
            pl.BlockSpec((tk, tn), lambda j, k: (k, j)),      # w (bf16)
            pl.BlockSpec((1, tn), lambda j, k: (0, j)),       # bias  (f32)
            pl.BlockSpec((1, tn), lambda j, k: (0, j)),       # gamma (f32)
            pl.BlockSpec((1, tn), lambda j, k: (0, j)),       # beta  (f32)
        ],
        out_specs=pl.BlockSpec((N, tn), lambda j, k: (0, j)),
        out_shape=jax.ShapeDtypeStruct((N, Dout), out_dtype),
        scratch_shapes=[pltpu.VMEM((N, tn), jnp.float32)],
        compiler_params=pltpu.CompilerParams(
            dimension_semantics=(_outer_parallel(), pltpu.ARBITRARY),
            vmem_limit_bytes=vmem_limit),
    )(x, w, b, gamma, beta)


# ----------------------------------------------------------------------------
# Kernel 2: fused per-group whitening on (N, d) column blocks of the (N, D)
# (shuffled) activations.  Per group: mean, unbiased covariance, Newton-Schulz
# inverse square root, and y = (x - mean) @ cov^{-1/2}.  No transposes, no
# intermediate mean/cov in HBM.
# ----------------------------------------------------------------------------
def _group_whiten_kernel(x_ref, o_ref, *, ns_iters, eps):
    x = x_ref[...].astype(jnp.float32)                        # (N, d)
    n, d = x.shape
    mean = jnp.mean(x, axis=0, keepdims=True)                 # (1, d)
    xc = x - mean
    xc_b = xc.astype(jnp.bfloat16)                            # bf16 MXU in, f32 acc

    # Unbiased covariance: xc^T @ xc / (n - 1), contraction over the batch dim.
    cov = jax.lax.dot_general(
        xc_b, xc_b, (((0,), (0,)), ((), ())),
        preferred_element_type=jnp.float32) / (n - 1)

    row = jax.lax.broadcasted_iota(jnp.int32, (d, d), 0)
    col = jax.lax.broadcasted_iota(jnp.int32, (d, d), 1)
    eye = (row == col).astype(jnp.float32)

    a = cov + eps * eye                                       # regularized cov
    tr = jnp.sum(a * eye, keepdims=True)                      # trace, as (1, 1)

    # Coupled Newton-Schulz iteration for (a / tr)^{-1/2} (replaces torch.symeig).
    def ns_body(_, yz):
        y_m, z_m = yz
        t_m = 1.5 * eye - 0.5 * jnp.dot(z_m, y_m, preferred_element_type=jnp.float32)
        return (jnp.dot(y_m, t_m, preferred_element_type=jnp.float32),
                jnp.dot(t_m, z_m, preferred_element_type=jnp.float32))

    _, z_m = jax.lax.fori_loop(0, ns_iters, ns_body, (a * (1.0 / tr), eye))
    w_zca = z_m * jax.lax.rsqrt(tr)                           # a^{-1/2}

    o_ref[...] = jnp.dot(xc_b, w_zca.astype(jnp.bfloat16),
                         preferred_element_type=jnp.float32).astype(o_ref.dtype)


# ----------------------------------------------------------------------------
# ShuffledGroupWhitening (num_groups=None -> G = ceil(2*D/N), shuffle=True)
# ----------------------------------------------------------------------------
def shuffled_group_whitening(x, key, num_groups=None, shuffle=True):
    N, D = x.shape
    G = num_groups if num_groups is not None else int(math.ceil(2 * D / N))
    assert D % G == 0, f"D={D} must be divisible by G={G}"
    d = D // G
    # Group column blocks ride the lane axis; need lane-aligned width (or G == 1).
    assert G == 1 or d % 128 == 0, f"group width d={d} must be a multiple of 128"

    if shuffle:
        # TODO(synk): the column shuffle/unshuffle gathers (torch.randperm
        # indexing) stay in XLA; fusing the perm into per-column DMAs (scalar
        # prefetch) or gathering in bf16 would save HBM passes.
        perm = jax.random.permutation(key, D)
        x = x[:, perm]

    y = pl.pallas_call(
        partial(_group_whiten_kernel, ns_iters=NS_ITERS, eps=WHITEN_EPS),
        grid=(G,),
        in_specs=[pl.BlockSpec((N, d), lambda g: (0, g))],
        out_specs=pl.BlockSpec((N, d), lambda g: (0, g)),
        out_shape=jax.ShapeDtypeStruct((N, D), jnp.float32),
        compiler_params=pltpu.CompilerParams(
            dimension_semantics=(_outer_parallel(),)),
    )(x)

    if shuffle:
        y = y[:, jnp.argsort(perm)]                           # undo column shuffle
    return y


# ----------------------------------------------------------------------------
# projection_MLP forward + deterministic parameter init
# ----------------------------------------------------------------------------
def init_params(key, in_dim, hidden_dim, out_dim):
    ks = jax.random.split(key, 6)

    def lin(kw, kb, din, dout):
        bound = 1.0 / math.sqrt(din)                          # PyTorch nn.Linear default init
        w = jax.random.uniform(kw, (din, dout), jnp.float32, -bound, bound)
        b = jax.random.uniform(kb, (1, dout), jnp.float32, -bound, bound)
        gamma = jnp.ones((1, dout), jnp.float32)              # BN affine defaults
        beta = jnp.zeros((1, dout), jnp.float32)
        # Weights cast to bf16 once here (parameters, cost amortized); bias and
        # BN affine/statistics stay f32.
        return (w.astype(jnp.bfloat16), b, gamma, beta)

    return (
        lin(ks[0], ks[1], in_dim, hidden_dim),
        lin(ks[2], ks[3], hidden_dim, hidden_dim),
        lin(ks[4], ks[5], hidden_dim, out_dim),
    )


def projection_mlp_forward(x, params, sdbn_key):
    (w1, b1, g1, be1), (w2, b2, g2, be2), (w3, b3, g3, be3) = params
    x = x.astype(jnp.bfloat16)                                # bf16 MXU input, cast once
    # TODO(synk): the three layers could be fused into a single pallas_call
    # (bf16 weights + VMEM-resident intermediates fit at SimSiam shapes).
    x = linear_bn(x, w1, b1, g1, be1, relu=True, out_dtype=jnp.bfloat16)   # layer1
    x = linear_bn(x, w2, b2, g2, be2, relu=True, out_dtype=jnp.bfloat16)   # layer2
    x = linear_bn(x, w3, b3, g3, be3, relu=False, out_dtype=jnp.float32)   # layer3 (BN, no ReLU)
    return shuffled_group_whitening(x, sdbn_key, num_groups=None, shuffle=True)


if __name__ == "__main__":
    # Small shapes consistent with the module's 2-D MLP input (N, in_dim), chosen
    # so the whitening group width is lane-aligned: G = ceil(2*256/256) = 2, d = 128.
    N, in_dim, hidden_dim, out_dim = 256, 128, 256, 256

    root = jax.random.PRNGKey(0)
    k_x, k_params, k_shuffle = jax.random.split(root, 3)

    x = jax.random.normal(k_x, (N, in_dim), jnp.float32)
    params = init_params(k_params, in_dim, hidden_dim, out_dim)

    y = projection_mlp_forward(x, params, k_shuffle)
    y = jax.block_until_ready(y)
    assert y.shape == (N, out_dim) and y.dtype == jnp.float32
    assert bool(jnp.all(jnp.isfinite(y)))
    print("KERNEL_OK")
</pallas_src>

<mosaic_0001>
module attributes {stable_mosaic.version = 11 : i64} {
  func.func @_linear_bn_kernel(%arg0: i32, %arg1: i32, %arg2: memref<256x128xbf16, #tpu.memory_space<vmem>>, %arg3: memref<128x256xbf16, #tpu.memory_space<vmem>>, %arg4: memref<1x256xf32, #tpu.memory_space<vmem>>, %arg5: memref<1x256xf32, #tpu.memory_space<vmem>>, %arg6: memref<1x256xf32, #tpu.memory_space<vmem>>, %arg7: memref<256x256xbf16, #tpu.memory_space<vmem>>, %arg8: memref<256x256xf32, #tpu.memory_space<vmem>>) attributes {dimension_semantics = [#tpu.dimension_semantics<parallel>, #tpu.dimension_semantics<arbitrary>], iteration_bounds = array<i64: 1, 1>, scalar_prefetch = 0 : i64, scratch_operands = 1 : i64, tpu.core_type = #tpu.core_type<tc>, window_params = [{pipeline_mode = #tpu.pipeline_mode<synchronous>, transform_indices = @transform_0, window_bounds = array<i64: 256, 128>}, {transform_indices = @transform_1, window_bounds = array<i64: 128, 256>}, {transform_indices = @transform_2, window_bounds = array<i64: 1, 256>}, {transform_indices = @transform_3, window_bounds = array<i64: 1, 256>}, {transform_indices = @transform_4, window_bounds = array<i64: 1, 256>}, {transform_indices = @transform_5, window_bounds = array<i64: 256, 256>}]} {
    %c0_i32 = arith.constant 0 : i32
    %0 = arith.cmpi eq, %arg1, %c0_i32 : i32
    %1 = arith.extui %0 : i1 to i32
    %c0_i32_0 = arith.constant 0 : i32
    %2 = arith.cmpi ne, %1, %c0_i32_0 : i32
    scf.if %2 {
      %cst_9 = arith.constant 0.000000e+00 : f32
      %15 = vector.broadcast %cst_9 : f32 to vector<256x256xf32>
      %c0_10 = arith.constant 0 : index
      %c0_11 = arith.constant 0 : index
      %16 = vector.load %arg8[%c0_10, %c0_11] : memref<256x256xf32, #tpu.memory_space<vmem>>, vector<256x256xf32>
      tpu.vector_store %arg8[%c0_10, %c0_11], %15 {strides = array<i32>} : memref<256x256xf32, #tpu.memory_space<vmem>>, vector<256x256xf32>,
    } else {
    }
    %c128_i32 = arith.constant 128 : i32
    %3 = arith.muli %arg1, %c128_i32 : i32
    %4 = tpu.assume_multiple %3, 128 : i32
    %c0 = arith.constant 0 : index
    %c0_1 = arith.constant 0 : index
    %5 = vector.load %arg8[%c0, %c0_1] : memref<256x256xf32, #tpu.memory_space<vmem>>, vector<256x256xf32>
    %c0_2 = arith.constant 0 : index
    %6 = arith.index_cast %4 : i32 to index
    %7 = vector.load %arg2[%c0_2, %6] : memref<256x128xbf16, #tpu.memory_space<vmem>>, vector<256x128xbf16>
    %c0_3 = arith.constant 0 : index
    %c0_4 = arith.constant 0 : index
    %8 = vector.load %arg3[%c0_3, %c0_4] : memref<128x256xbf16, #tpu.memory_space<vmem>>, vector<128x256xbf16>
    %cst = arith.constant dense<0.000000e+00> : vector<256x256xf32>
    %9 = tpu.matmul %7, %8, %cst {dimension_numbers = #tpu.dot_dimension_numbers<[1], [0], [0], [1], [0, 0, 1, 1], [], []>} : vector<256x128xbf16>, vector<128x256xbf16>, vector<256x256xf32> -> vector<256x256xf32>
    %10 = arith.addf %5, %9 : vector<256x256xf32>
    %c0_5 = arith.constant 0 : index
    %c0_6 = arith.constant 0 : index
    %11 = vector.load %arg8[%c0_5, %c0_6] : memref<256x256xf32, #tpu.memory_space<vmem>>, vector<256x256xf32>
    tpu.vector_store %arg8[%c0_5, %c0_6], %10 {strides = array<i32>} : memref<256x256xf32, #tpu.memory_space<vmem>>, vector<256x256xf32>,
    %c0_i32_7 = arith.constant 0 : i32
    %12 = arith.cmpi eq, %arg1, %c0_i32_7 : i32
    %13 = arith.extui %12 : i1 to i32
    %c0_i32_8 = arith.constant 0 : i32
    %14 = arith.cmpi ne, %13, %c0_i32_8 : i32
    scf.if %14 {
      %c0_9 = arith.constant 0 : index
      %c0_10 = arith.constant 0 : index
      %15 = vector.load %arg8[%c0_9, %c0_10] : memref<256x256xf32, #tpu.memory_space<vmem>>, vector<256x256xf32>
      %c0_11 = arith.constant 0 : index
      %c0_12 = arith.constant 0 : index
      %16 = vector.load %arg4[%c0_11, %c0_12] : memref<1x256xf32, #tpu.memory_space<vmem>>, vector<1x256xf32>
      %17 = vector.broadcast %16 : vector<1x256xf32> to vector<256x256xf32>
      %18 = arith.addf %15, %17 : vector<256x256xf32>
      %cst_13 = arith.constant dense<0.000000e+00> : vector<256xf32>
      %19 = vector.multi_reduction <add>, %18, %cst_13 [0] : vector<256x256xf32> to vector<256xf32>
      %20 = vector.shape_cast %19 : vector<256xf32> to vector<1x256xf32>
      %cst_14 = arith.constant 2.560000e+02 : f32
      %21 = vector.broadcast %cst_14 : f32 to vector<1x256xf32>
      %22 = arith.divf %20, %21 : vector<1x256xf32>
      %23 = vector.broadcast %22 : vector<1x256xf32> to vector<256x256xf32>
      %24 = arith.subf %18, %23 : vector<256x256xf32>
      %25 = arith.mulf %24, %24 : vector<256x256xf32>
      %cst_15 = arith.constant dense<0.000000e+00> : vector<256xf32>
      %26 = vector.multi_reduction <add>, %25, %cst_15 [0] : vector<256x256xf32> to vector<256xf32>
      %27 = vector.shape_cast %26 : vector<256xf32> to vector<1x256xf32>
      %cst_16 = arith.constant 2.560000e+02 : f32
      %28 = vector.broadcast %cst_16 : f32 to vector<1x256xf32>
      %29 = arith.divf %27, %28 : vector<1x256xf32>
      %30 = vector.broadcast %22 : vector<1x256xf32> to vector<256x256xf32>
      %31 = arith.subf %18, %30 : vector<256x256xf32>
      %cst_17 = arith.constant 9.99999974E-6 : f32
      %32 = vector.broadcast %cst_17 : f32 to vector<1x256xf32>
      %33 = arith.addf %29, %32 : vector<1x256xf32>
      %34 = math.rsqrt %33 : vector<1x256xf32>
      %35 = vector.broadcast %34 : vector<1x256xf32> to vector<256x256xf32>
      %36 = arith.mulf %31, %35 : vector<256x256xf32>
      %c0_18 = arith.constant 0 : index
      %c0_19 = arith.constant 0 : index
      %37 = vector.load %arg5[%c0_18, %c0_19] : memref<1x256xf32, #tpu.memory_space<vmem>>, vector<1x256xf32>
      %38 = vector.broadcast %37 : vector<1x256xf32> to vector<256x256xf32>
      %39 = arith.mulf %36, %38 : vector<256x256xf32>
      %c0_20 = arith.constant 0 : index
      %c0_21 = arith.constant 0 : index
      %40 = vector.load %arg6[%c0_20, %c0_21] : memref<1x256xf32, #tpu.memory_space<vmem>>, vector<1x256xf32>
      %41 = vector.broadcast %40 : vector<1x256xf32> to vector<256x256xf32>
      %42 = arith.addf %39, %41 : vector<256x256xf32>
      %cst_22 = arith.constant 0.000000e+00 : f32
      %43 = vector.broadcast %cst_22 : f32 to vector<256x256xf32>
      %44 = arith.maximumf %42, %43 : vector<256x256xf32>
      %45 = arith.truncf %44 : vector<256x256xf32> to vector<256x256xbf16>
      %c0_23 = arith.constant 0 : index
      %c0_24 = arith.constant 0 : index
      %46 = vector.load %arg7[%c0_23, %c0_24] : memref<256x256xbf16, #tpu.memory_space<vmem>>, vector<256x256xbf16>
      tpu.vector_store %arg7[%c0_23, %c0_24], %45 {strides = array<i32>} : memref<256x256xbf16, #tpu.memory_space<vmem>>, vector<256x256xbf16>,
    } else {
    }
    return
  }
  func.func @transform_0(%arg0: i32, %arg1: i32) -> (i32, i32) {
    %c0_i32 = arith.constant 0 : i32
    %c0_i32_0 = arith.constant 0 : i32
    %c0_i32_1 = arith.constant 0 : i32
    return %c0_i32, %c0_i32_0 : i32, i32
  }
  func.func @transform_1(%arg0: i32, %arg1: i32) -> (i32, i32) {
    %c0_i32 = arith.constant 0 : i32
    return %arg1, %arg0 : i32, i32
  }
  func.func @transform_2(%arg0: i32, %arg1: i32) -> (i32, i32) {
    %c0_i32 = arith.constant 0 : i32
    %c0_i32_0 = arith.constant 0 : i32
    return %c0_i32, %arg0 : i32, i32
  }
  func.func @transform_3(%arg0: i32, %arg1: i32) -> (i32, i32) {
    %c0_i32 = arith.constant 0 : i32
    %c0_i32_0 = arith.constant 0 : i32
    return %c0_i32, %arg0 : i32, i32
  }
  func.func @transform_4(%arg0: i32, %arg1: i32) -> (i32, i32) {
    %c0_i32 = arith.constant 0 : i32
    %c0_i32_0 = arith.constant 0 : i32
    return %c0_i32, %arg0 : i32, i32
  }
  func.func @transform_5(%arg0: i32, %arg1: i32) -> (i32, i32) {
    %c0_i32 = arith.constant 0 : i32
    %c0_i32_0 = arith.constant 0 : i32
    return %c0_i32, %arg0 : i32, i32
  }
}

</mosaic_0001>

<bundles_post_ra>
// kernel: tpu_custom_call.1
= control target key start
LH: loop header
LB: loop body
LE: loop exit
PB: predicated region body
PF: predicated region fallthrough
CT: control target
= control target key end

     0   :  { %10 = vsyncpa [#allocation4], 0  ;;  %s3039_s0 = inlined_call_operand.hbm [shape: bf16[256,128], index: 0, kind: input, shape index: {}]   ;;  %s3040_s1 = inlined_call_operand.hbm [shape: bf16[128,256], index: 1, kind: input, shape index: {}]   ;;  %s3041_s2 = inlined_call_operand.hbm [shape: f32[1,256], index: 2, kind: input, shape index: {}]   ;;  %s3042_s3 = inlined_call_operand.vmem [shape: f32[1,256], index: 3, kind: input, shape index: {}]   ;;  %s3043_s4 = inlined_call_operand.hbm [shape: f32[1,256], index: 4, kind: input, shape index: {}]   ;;  %s3044_s5 = inlined_call_operand.hbm [shape: bf16[256,256], index: 5, kind: output, shape index: {}]  }
   0x1   :  { %11 = vsyncpa [#allocation7], 0 }
   0x2   :  { %12 = vsyncpa [#allocation10], 0  ;;  %s31_s20 = sshll.u32 %s3040_s1, 4  ;;  %s32_s20 = int_to_ptr.hbm [resolvable:$true] %s31_s20 }
   0x3   :  { %13 = vsyncpa [#allocation5], 0  ;;  %s1868_s21 = smov [#allocation6]   ;;  %s18_s25 = sshll.u32 %s3039_s0, 4  ;;  %s19_s25 = int_to_ptr.hbm [resolvable:$true] %s18_s25 }
   0x4   :  { %s33_s22 = sshll.u32 %s1868_s21, 4  ;;  %s1869_s26 = smov 128   ;;  %s34_s22 = int_to_ptr.vmem [resolvable:$true] %s33_s22 }
   0x5   :  { %s1870_s27 = smov 8   ;;  %s1871_s28 = smov [#allocation3]  }
   0x6   :  { %39 = dma.hbm_to_vmem [thread:$0]  %s32_s20, 2048, %s34_s22, [#allocation7], %s1869_s26, %s1869_s26, %s1870_s27  }
   0x7   :  { %s20_s29 = sshll.u32 %s1871_s28, 4  ;;  %s1872_s1 = smov 64   ;;  %s21_s29 = int_to_ptr.vmem [resolvable:$true] %s20_s29 }
   0x8   :  { %s1873_s30 = smov 4   ;;  %s45_s8 = sshll.u32 %s3041_s2, 4  ;;  %s46_s8 = int_to_ptr.hbm [resolvable:$true] %s45_s8 }
   0x9   :  { %26 = dma.hbm_to_vmem [thread:$0]  %s19_s25, 2048, %s21_s29, [#allocation4], %s1872_s1, %s1872_s1, %s1873_s30  }
   0xa   :  { %s1874_s9 = smov [#allocation8]   ;;  %s58_s12 = sshll.u32 %s3043_s4, 4  ;;  %s59_s12 = int_to_ptr.hbm [resolvable:$true] %s58_s12 }
   0xb   :  { %s47_s0 = sshll.u32 %s1874_s9, 4  ;;  %s1875_s13 = smov [#allocation9]   ;;  %s48_s0 = int_to_ptr.vmem [resolvable:$true] %s47_s0 }
   0xc   :  { %50 = dma.hbm_to_vmem [thread:$0]  %s46_s8, 32, %s48_s0, [#allocation7]  }
   0xd   :  { %s60_s14 = sshll.u32 %s1875_s13, 4  ;;  %s61_s14 = int_to_ptr.vmem [resolvable:$true] %s60_s14 }
   0xe   :  { %63 = dma.hbm_to_vmem [thread:$0]  %s59_s12, 32, %s61_s14, [#allocation10]  }
   0xf   :  { %1860 = dma.done.wait [#allocation4], 2048  }
  0x10   :  { %1861 = vsyncadd [#allocation4], 4294965248 }
  0x11   :  { %1862 = dma.done.wait [#allocation7], 2080  }
  0x12   :  { %1863 = vsyncadd [#allocation7], 4294965216 }
  0x13   :  { %1864 = dma.done.wait [#allocation10], 32  }
  0x14   :  { %1865 = vsyncadd [#allocation10], 4294967264  ;;  %v1670_v0 = vld [vmem:[#allocation6 + $0x70] sm:$0xf]  ;;  %v1707_v1 = vld [vmem:[#allocation6 + $0x74] sm:$0xf0] }
  0x15   :  { %v1706_v2 = vld [vmem:[#allocation6 + $0x74] sm:$0xf]  ;;  %v1671_v3 = vor.u32 %v1707_v1, %v1670_v0  ;;  %v1672_v4 = vld [vmem:[#allocation6 + $0x78] sm:$0xf0]  ;;  %v1662_v5 = vld [vmem:[#allocation6 + $0x60] sm:$0xf] }
  0x16   :  { %v1705_v6 = vld [vmem:[#allocation6 + $0x64] sm:$0xf0]  ;;  %v1675_v7 = vor.u32 %v1706_v2, %v1672_v4  ;;  %v1704_v8 = vld [vmem:[#allocation6 + $0x64] sm:$0xf]  ;;  %v1664_v9 = vld [vmem:[#allocation6 + $0x68] sm:$0xf0] }
  0x17   :  { %441 = vmatpush.bf16.msra.mxu0 %v1671_v3  ;;  %v1663_v10 = vor.u32 %v1705_v6, %v1662_v5  ;;  %1708 = vmatpush.bf16.msra.mxu2 %v1671_v3  ;;  %v1667_v11 = vor.u32 %v1704_v8, %v1664_v9  ;;  %v1654_v12 = vld [vmem:[#allocation6 + $0x50] sm:$0xf]  ;;  %v1703_v13 = vld [vmem:[#allocation6 + $0x54] sm:$0xf0]  ;;  %v1702_v14 = vld [vmem:[#allocation6 + $0x54] sm:$0xf] }
  0x18   :  { %530 = vmatpush.bf16.msra.mxu1 %v1675_v7  ;;  %1716 = vmatpush.bf16.msra.mxu3 %v1675_v7  ;;  %v1656_v15 = vld [vmem:[#allocation6 + $0x58] sm:$0xf0]  ;;  %v1655_v16 = vor.u32 %v1703_v13, %v1654_v12  ;;  %v1646_v18 = vld [vmem:[#allocation6 + $0x40] sm:$0xf]  ;;  %v1701_v19 = vld [vmem:[#allocation6 + $0x44] sm:$0xf0] }
  0x19   :  { %v1659_v17 = vor.u32 %v1702_v14, %v1656_v15  ;;  %v1700_v20 = vld [vmem:[#allocation6 + $0x44] sm:$0xf]  ;;  %v1648_v21 = vld [vmem:[#allocation6 + $0x48] sm:$0xf0]  ;;  %v1647_v22 = vor.u32 %v1701_v19, %v1646_v18  ;;  %v1638_v24 = vld [vmem:[#allocation6 + $0x30] sm:$0xf] }
  0x1a   :  { %v1651_v23 = vor.u32 %v1700_v20, %v1648_v21  ;;  %v1699_v25 = vld [vmem:[#allocation6 + $0x34] sm:$0xf0]  ;;  %v1698_v26 = vld [vmem:[#allocation6 + $0x34] sm:$0xf]  ;;  %v1640_v27 = vld [vmem:[#allocation6 + $0x38] sm:$0xf0] }
  0x1b   :  { %442 = vmatpush.bf16.msra.mxu0 %v1663_v10  ;;  %1709 = vmatpush.bf16.msra.mxu2 %v1663_v10  ;;  %v1639_v28 = vor.u32 %v1699_v25, %v1638_v24  ;;  %v1643_v29 = vor.u32 %v1698_v26, %v1640_v27  ;;  %v1630_v30 = vld [vmem:[#allocation6 + $0x20] sm:$0xf]  ;;  %v1697_v31 = vld [vmem:[#allocation6 + $0x24] sm:$0xf0]  ;;  %v1696_v32 = vld [vmem:[#allocation6 + $0x24] sm:$0xf] }
  0x1c   :  { %531 = vmatpush.bf16.msra.mxu1 %v1667_v11  ;;  %1717 = vmatpush.bf16.msra.mxu3 %v1667_v11  ;;  %v1632_v33 = vld [vmem:[#allocation6 + $0x28] sm:$0xf0]  ;;  %v1631_v34 = vor.u32 %v1697_v31, %v1630_v30  ;;  %v1622_v36 = vld [vmem:[#allocation6 + $0x10] sm:$0xf]  ;;  %v1695_v37 = vld [vmem:[#allocation6 + $0x14] sm:$0xf0] }
  0x1d   :  { %v1635_v35 = vor.u32 %v1696_v32, %v1632_v33  ;;  %v1694_v38 = vld [vmem:[#allocation6 + $0x14] sm:$0xf]  ;;  %v1624_v39 = vld [vmem:[#allocation6 + $0x18] sm:$0xf0]  ;;  %v1623_v40 = vor.u32 %v1695_v37, %v1622_v36  ;;  %v1614_v42 = vld [vmem:[#allocation6] sm:$0xf] }
  0x1e   :  { %v1627_v41 = vor.u32 %v1694_v38, %v1624_v39  ;;  %v1693_v43 = vld [vmem:[#allocation6 + $0x4] sm:$0xf0]  ;;  %v1692_v44 = vld [vmem:[#allocation6 + $0x4] sm:$0xf]  ;;  %v1616_v45 = vld [vmem:[#allocation6 + $0x8] sm:$0xf0] }
  0x1f   :  { %443 = vmatpush.bf16.msra.mxu0 %v1655_v16  ;;  %1710 = vmatpush.bf16.msra.mxu2 %v1655_v16  ;;  %v1615_v46 = vor.u32 %v1693_v43, %v1614_v42  ;;  %v1619_v47 = vor.u32 %v1692_v44, %v1616_v45  ;;  %v1676_v48 = vld [vmem:[#allocation3] sm:$0xff]  ;;  %v1677_v50 = vld [vmem:[#allocation3 + $0x8] sm:$0xff]  ;;  %v1678_v52 = vld [vmem:[#allocation3 + $0x10] sm:$0xff]  ;;  %s1531_s18 = sshll.u32 %s3044_s5, 4  ;;  %s1532_s18 = int_to_ptr.hbm [resolvable:$true] %s1531_s18 }
  0x20   :  { %532 = vmatpush.bf16.msra.mxu1 %v1659_v17  ;;  %1718 = vmatpush.bf16.msra.mxu3 %v1659_v17  ;;  %v1684_v49 = vld [vmem:[#allocation3 + $0x40] sm:$0xff]  ;;  %v1685_v51 = vld [vmem:[#allocation3 + $0x48] sm:$0xff]  ;;  %v1686_v53 = vld [vmem:[#allocation3 + $0x50] sm:$0xff] }
  0x21   :  { %v1679_v54 = vld [vmem:[#allocation3 + $0x18] sm:$0xff]  ;;  %v1680_v56 = vld [vmem:[#allocation3 + $0x20] sm:$0xff]  ;;  %v1681_v58 = vld [vmem:[#allocation3 + $0x28] sm:$0xff] }
  0x22   :  { %v1687_v55 = vld [vmem:[#allocation3 + $0x58] sm:$0xff]  ;;  %v1688_v57 = vld [vmem:[#allocation3 + $0x60] sm:$0xff]  ;;  %v1689_v59 = vld [vmem:[#allocation3 + $0x68] sm:$0xff] }
  0x23   :  { %444 = vmatpush.bf16.msra.mxu0 %v1647_v22  ;;  %1711 = vmatpush.bf16.msra.mxu2 %v1647_v22  ;;  %v1682_v60 = vld [vmem:[#allocation3 + $0x30] sm:$0xff]  ;;  %v1683_v62 = vld [vmem:[#allocation3 + $0x38] sm:$0xff] }
  0x24   :  { %533 = vmatpush.bf16.msra.mxu1 %v1651_v23  ;;  %1719 = vmatpush.bf16.msra.mxu3 %v1651_v23  ;;  %v1690_v61 = vld [vmem:[#allocation3 + $0x70] sm:$0xff]  ;;  %v1691_v63 = vld [vmem:[#allocation3 + $0x78] sm:$0xff] }
  0x27   :  { %445 = vmatpush.bf16.msra.mxu0 %v1639_v28  ;;  %1712 = vmatpush.bf16.msra.mxu2 %v1639_v28 }
  0x28   :  { %534 = vmatpush.bf16.msra.mxu1 %v1643_v29  ;;  %1720 = vmatpush.bf16.msra.mxu3 %v1643_v29 }
  0x2b   :  { %446 = vmatpush.bf16.msra.mxu0 %v1631_v34  ;;  %1713 = vmatpush.bf16.msra.mxu2 %v1631_v34 }
  0x2c   :  { %535 = vmatpush.bf16.msra.mxu1 %v1635_v35  ;;  %1721 = vmatpush.bf16.msra.mxu3 %v1635_v35 }
  0x2f   :  { %447 = vmatpush.bf16.msra.mxu0 %v1623_v40  ;;  %1714 = vmatpush.bf16.msra.mxu2 %v1623_v40  ;;  %v814_v40 = vld [vmem:[#allocation8] sm:$0x3] }
  0x30   :  { %536 = vmatpush.bf16.msra.mxu1 %v1627_v41  ;;  %1722 = vmatpush.bf16.msra.mxu3 %v1627_v41  ;;  %v1959_v42 = vperm.slane %v814_v40, 0  ;;  %v1961_v44 = vperm.slane %v814_v40, 1 }
  0x33   :  { %448 = vmatpush.bf16.msra.mxu0 %v1615_v46  ;;  %1715 = vmatpush.bf16.msra.mxu2 %v1615_v46 }
  0x34   :  { %537 = vmatpush.bf16.msra.mxu1 %v1619_v47  ;;  %1723 = vmatpush.bf16.msra.mxu3 %v1619_v47 }
  0x36   :  { %449 = vmatmul.bf16.vlgmr.msra.gmra.mxu0 %v1676_v48  ;;  %489 = vmatmul.bf16.vlgmr.msra.gmra.mxu2 %v1684_v49 }
  0x37   :  { %538 = vmatmul.bf16.vlgmr.msra.gmra.mxu1 %v1676_v48  ;;  %578 = vmatmul.bf16.vlgmr.msra.gmra.mxu3 %v1684_v49 }
  0x46   :  { %454 = vmatmul.bf16.gmra.mxu0 %v1677_v50  ;;  %494 = vmatmul.bf16.gmra.mxu2 %v1685_v51 }
  0x47   :  { %543 = vmatmul.bf16.gmra.mxu1 %v1677_v50  ;;  %583 = vmatmul.bf16.gmra.mxu3 %v1685_v51 }
  0x56   :  { %459 = vmatmul.bf16.gmra.mxu0 %v1678_v52  ;;  %499 = vmatmul.bf16.gmra.mxu2 %v1686_v53 }
  0x57   :  { %548 = vmatmul.bf16.gmra.mxu1 %v1678_v52  ;;  %588 = vmatmul.bf16.gmra.mxu3 %v1686_v53 }
  0x66   :  { %464 = vmatmul.bf16.gmra.mxu0 %v1679_v54  ;;  %504 = vmatmul.bf16.gmra.mxu2 %v1687_v55 }
  0x67   :  { %553 = vmatmul.bf16.gmra.mxu1 %v1679_v54  ;;  %593 = vmatmul.bf16.gmra.mxu3 %v1687_v55 }
  0x76   :  { %469 = vmatmul.bf16.gmra.mxu0 %v1680_v56  ;;  %509 = vmatmul.bf16.gmra.mxu2 %v1688_v57 }
  0x77   :  { %558 = vmatmul.bf16.gmra.mxu1 %v1680_v56  ;;  %598 = vmatmul.bf16.gmra.mxu3 %v1688_v57 }
  0x86   :  { %474 = vmatmul.bf16.gmra.mxu0 %v1681_v58  ;;  %514 = vmatmul.bf16.gmra.mxu2 %v1689_v59 }
  0x87   :  { %563 = vmatmul.bf16.gmra.mxu1 %v1681_v58  ;;  %603 = vmatmul.bf16.gmra.mxu3 %v1689_v59 }
  0x96   :  { %479 = vmatmul.bf16.gmra.mxu0 %v1682_v60  ;;  %519 = vmatmul.bf16.gmra.mxu2 %v1690_v61 }
  0x97   :  { %568 = vmatmul.bf16.gmra.mxu1 %v1682_v60  ;;  %608 = vmatmul.bf16.gmra.mxu3 %v1690_v61 }
  0xa6   :  { %484 = vmatmul.bf16.gmra.mxu0 %v1683_v62  ;;  %524 = vmatmul.bf16.gmra.mxu2 %v1691_v63 }
  0xa7   :  { %573 = vmatmul.bf16.gmra.mxu1 %v1683_v62  ;;  %613 = vmatmul.bf16.gmra.mxu3 %v1691_v63 }
  0xb3   :  { %v450_v0 = vpop.f32.mrf.mxu0 }
  0xb4   :  { %v539_v1 = vpop.f32.mrf.mxu1  ;;  %v1972_v48 = vadd.f32 %v1959_v42, %v450_v0 }
  0xb5   :  { %v1980_v51 = vadd.f32 %v1961_v44, %v539_v1 }
  0xb7   :  { %3087 = vst [vmem:[#allocation17_spill] sm:$0xff] %v1980_v51 }
  0xb9   :  { %v1923_v2 = vpop.f32.mrf.mxu2 }
  0xba   :  { %v1925_v3 = vpop.f32.mrf.mxu3 }
  0xbb   :  { %v452_v4 = vpop.f32.mrf.mxu0 }
  0xbc   :  { %v541_v5 = vpop.f32.mrf.mxu1  ;;  %v1966_v46 = vadd.f32 %v1959_v42, %v452_v4 }
  0xbd   :  { %v1969_v47 = vadd.f32 %v1961_v44, %v541_v5 }
  0xbe   :  { %v884_v53 = vadd.f32 %v1966_v46, %v1972_v48 }
  0xbf   :  { %3086 = vst [vmem:[#allocation16_spill] sm:$0xff] %v1969_v47  ;;  %v921_v55 = vadd.f32 %v1969_v47, %v1980_v51 }
  0xc1   :  { %v1927_v6 = vpop.f32.mrf.mxu2 }
  0xc2   :  { %v1929_v7 = vpop.f32.mrf.mxu3 }
  0xc3   :  { %v455_v8 = vpop.f32.mrf.mxu0 }
  0xc4   :  { %v544_v9 = vpop.f32.mrf.mxu1  ;;  %v1975_v49 = vadd.f32 %v1959_v42, %v455_v8 }
  0xc5   :  { %v1983_v52 = vadd.f32 %v1961_v44, %v544_v9 }
  0xc6   :  { %v885_v58 = vadd.f32 %v884_v53, %v1975_v49 }
  0xc7   :  { %3088 = vst [vmem:[#allocation18_spill] sm:$0xff] %v1983_v52  ;;  %v922_v61 = vadd.f32 %v921_v55, %v1983_v52 }
  0xc9   :  { %v1931_v10 = vpop.f32.mrf.mxu2 }
  0xca   :  { %v1933_v11 = vpop.f32.mrf.mxu3 }
  0xcb   :  { %v457_v12 = vpop.f32.mrf.mxu0 }
  0xcc   :  { %v546_v13 = vpop.f32.mrf.mxu1  ;;  %v1988_v54 = vadd.f32 %v1959_v42, %v457_v12 }
  0xcd   :  { %v1993_v56 = vadd.f32 %v1961_v44, %v546_v13 }
  0xce   :  { %v886_v63 = vadd.f32 %v885_v58, %v1988_v54 }
  0xcf   :  { %3089 = vst [vmem:[#allocation19_spill] sm:$0xff] %v1993_v56  ;;  %v923_v1 = vadd.f32 %v922_v61, %v1993_v56 }
  0xd1   :  { %v1935_v14 = vpop.f32.mrf.mxu2 }
  0xd2   :  { %v1937_v17 = vpop.f32.mrf.mxu3 }
  0xd3   :  { %v460_v15 = vpop.f32.mrf.mxu0 }
  0xd4   :  { %v549_v16 = vpop.f32.mrf.mxu1  ;;  %v1997_v59 = vadd.f32 %v1959_v42, %v460_v15 }
  0xd5   :  { %v2001_v62 = vadd.f32 %v1961_v44, %v549_v16 }
  0xd6   :  { %v887_v8 = vadd.f32 %v886_v63, %v1997_v59 }
  0xd7   :  { %3090 = vst [vmem:[#allocation20_spill] sm:$0xff] %v2001_v62  ;;  %v924_v12 = vadd.f32 %v923_v1, %v2001_v62 }
  0xd9   :  { %v1939_v19 = vpop.f32.mrf.mxu2 }
  0xda   :  { %v1941_v21 = vpop.f32.mrf.mxu3 }
  0xdb   :  { %v462_v18 = vpop.f32.mrf.mxu0 }
  0xdc   :  { %v551_v20 = vpop.f32.mrf.mxu1  ;;  %v2005_v0 = vadd.f32 %v1959_v42, %v462_v18 }
  0xdd   :  { %v2009_v4 = vadd.f32 %v1961_v44, %v551_v20 }
  0xde   :  { %v888_v15 = vadd.f32 %v887_v8, %v2005_v0 }
  0xdf   :  { %3091 = vst [vmem:[#allocation21_spill] sm:$0xff] %v2009_v4  ;;  %v925_v20 = vadd.f32 %v924_v12, %v2009_v4 }
  0xe1   :  { %v1943_v24 = vpop.f32.mrf.mxu2 }
  0xe2   :  { %v1945_v25 = vpop.f32.mrf.mxu3 }
  0xe3   :  { %v465_v22 = vpop.f32.mrf.mxu0 }
  0xe4   :  { %v554_v23 = vpop.f32.mrf.mxu1  ;;  %v2015_v9 = vadd.f32 %v1959_v42, %v465_v22 }
  0xe5   :  { %v2019_v13 = vadd.f32 %v1961_v44, %v554_v23 }
  0xe6   :  { %v889_v22 = vadd.f32 %v888_v15, %v2015_v9 }
  0xe7   :  { %3092 = vst [vmem:[#allocation22_spill] sm:$0xff] %v2019_v13  ;;  %v926_v58 = vadd.f32 %v925_v20, %v2019_v13 }
  0xe9   :  { %v1947_v28 = vpop.f32.mrf.mxu2 }
  0xea   :  { %v1949_v29 = vpop.f32.mrf.mxu3 }
  0xeb   :  { %v467_v26 = vpop.f32.mrf.mxu0 }
  0xec   :  { %v556_v27 = vpop.f32.mrf.mxu1  ;;  %v2023_v16 = vadd.f32 %v1959_v42, %v467_v26 }
  0xed   :  { %v2029_v40 = vadd.f32 %v1961_v44, %v556_v27 }
  0xee   :  { %v890_v26 = vadd.f32 %v889_v22, %v2023_v16 }
  0xef   :  { %3093 = vst [vmem:[#allocation23_spill] sm:$0xff] %v2029_v40  ;;  %v927_v27 = vadd.f32 %v926_v58, %v2029_v40 }
  0xf1   :  { %v1951_v32 = vpop.f32.mrf.mxu2 }
  0xf2   :  { %v1953_v35 = vpop.f32.mrf.mxu3 }
  0xf3   :  { %v470_v30 = vpop.f32.mrf.mxu0 }
  0xf4   :  { %v559_v31 = vpop.f32.mrf.mxu1  ;;  %v2033_v55 = vadd.f32 %v1959_v42, %v470_v30 }
  0xf5   :  { %v2037_v61 = vadd.f32 %v1961_v44, %v559_v31 }
  0xf6   :  { %v891_v8 = vadd.f32 %v890_v26, %v2033_v55 }
  0xf7   :  { %3094 = vst [vmem:[#allocation24_spill] sm:$0xff] %v2037_v61  ;;  %v928_v12 = vadd.f32 %v927_v27, %v2037_v61 }
  0xf9   :  { %v1955_v37 = vpop.f32.mrf.mxu2 }
  0xfa   :  { %v1957_v39 = vpop.f32.mrf.mxu3 }
  0xfb   :  { %v472_v33 = vpop.f32.mrf.mxu0 }
  0xfc   :  { %v561_v34 = vpop.f32.mrf.mxu1  ;;  %v2041_v63 = vadd.f32 %v1959_v42, %v472_v33 }
  0xfd   :  { %v2045_v1 = vadd.f32 %v1961_v44, %v561_v34 }
  0xfe   :  { %v892_v33 = vadd.f32 %v891_v8, %v2041_v63 }
  0xff   :  { %3095 = vst [vmem:[#allocation25_spill] sm:$0xff] %v2045_v1  ;;  %v929_v34 = vadd.f32 %v928_v12, %v2045_v1 }
 0x101   :  { %v1963_v45 = vpop.f32.mrf.mxu2 }
 0x102   :  { %v1977_v50 = vpop.f32.mrf.mxu3 }
 0x103   :  { %v475_v36 = vpop.f32.mrf.mxu0 }
 0x104   :  { %v564_v38 = vpop.f32.mrf.mxu1  ;;  %v2049_v30 = vadd.f32 %v1959_v42, %v475_v36 }
 0x105   :  { %v2053_v31 = vadd.f32 %v1961_v44, %v564_v38 }
 0x106   :  { %3096 = vst [vmem:[#allocation26_spill] sm:$0xff] %v2049_v30  ;;  %v893_v36 = vadd.f32 %v892_v33, %v2049_v30 }
 0x107   :  { %3097 = vst [vmem:[#allocation27_spill] sm:$0xff] %v2053_v31  ;;  %v930_v61 = vadd.f32 %v929_v34, %v2053_v31 }
 0x109   :  { %v2011_v5 = vpop.f32.mrf.mxu2 }
 0x10a   :  { %v2025_v18 = vpop.f32.mrf.mxu3 }
 0x10b   :  { %v477_v41 = vpop.f32.mrf.mxu0 }
 0x10c   :  { %v566_v43 = vpop.f32.mrf.mxu1  ;;  %v2059_v20 = vadd.f32 %v1959_v42, %v477_v41 }
 0x10d   :  { %v2063_v22 = vadd.f32 %v1961_v44, %v566_v43 }
 0x10e   :  { %3098 = vst [vmem:[#allocation28_spill] sm:$0xff] %v2059_v20  ;;  %v894_v41 = vadd.f32 %v893_v36, %v2059_v20 }
 0x10f   :  { %3099 = vst [vmem:[#allocation29_spill] sm:$0xff] %v2063_v22  ;;  %v931_v43 = vadd.f32 %v930_v61, %v2063_v22 }
 0x111   :  { %v2055_v15 = vpop.f32.mrf.mxu2 }
 0x112   :  { %v2069_v27 = vpop.f32.mrf.mxu3 }
 0x113   :  { %v480_v57 = vpop.f32.mrf.mxu0 }
 0x114   :  { %v569_v60 = vpop.f32.mrf.mxu1  ;;  %v2067_v26 = vadd.f32 %v1959_v42, %v480_v57 }
 0x115   :  { %v2073_v8 = vadd.f32 %v1961_v44, %v569_v60 }
 0x116   :  { %3100 = vst [vmem:[#allocation30_spill] sm:$0xff] %v2067_v26  ;;  %v895_v57 = vadd.f32 %v894_v41, %v2067_v26 }
 0x117   :  { %3101 = vst [vmem:[#allocation31_spill] sm:$0xff] %v2073_v8  ;;  %v932_v34 = vadd.f32 %v931_v43, %v2073_v8 }
 0x119   :  { %v520_v40 = vpop.f32.mrf.mxu2 }
 0x11b   :  { %v482_v53 = vpop.f32.mrf.mxu0 }
 0x11c   :  { %v571_v23 = vpop.f32.mrf.mxu1  ;;  %v2077_v12 = vadd.f32 %v1959_v42, %v482_v53 }
 0x11d   :  { %v2081_v33 = vadd.f32 %v1961_v44, %v571_v23 }
 0x11e   :  { %3102 = vst [vmem:[#allocation32_spill] sm:$0xff] %v2077_v12  ;;  %v896_v36 = vadd.f32 %v895_v57, %v2077_v12  ;;  %v609_v57 = vpop.f32.mrf.mxu3 }
 0x11f   :  { %3103 = vst [vmem:[#allocation33_spill] sm:$0xff] %v2081_v33  ;;  %v933_v53 = vadd.f32 %v932_v34, %v2081_v33  ;;  %v2108_v34 = vadd.f32 %v1961_v44, %v1925_v3  ;;  %v2218_v4 = vadd.f32 %v1961_v44, %v609_v57 }
 0x121   :  { %3106 = vst [vmem:[#allocation36_spill] sm:$0xff] %v2108_v34 }
 0x123   :  { %v485_v58 = vpop.f32.mrf.mxu0 }
 0x124   :  { %v574_v38 = vpop.f32.mrf.mxu1  ;;  %v2085_v1 = vadd.f32 %v1959_v42, %v485_v58 }
 0x125   :  { %v2089_v60 = vadd.f32 %v1961_v44, %v574_v38  ;;  %v2103_v38 = vadd.f32 %v1959_v42, %v1923_v2 }
 0x126   :  { %v897_v61 = vadd.f32 %v896_v36, %v2085_v1  ;;  %v2113_v36 = vadd.f32 %v1959_v42, %v1927_v6 }
 0x127   :  { %3104 = vst [vmem:[#allocation34_spill] sm:$0xff] %v2089_v60  ;;  %v934_v58 = vadd.f32 %v933_v53, %v2089_v60 }
 0x12b   :  { %v487_v31 = vpop.f32.mrf.mxu0 }
 0x12c   :  { %v2095_v23 = vadd.f32 %v1959_v42, %v487_v31  ;;  %v576_v41 = vpop.f32.mrf.mxu1 }
 0x12d   :  { %v2099_v22 = vadd.f32 %v1961_v44, %v576_v41  ;;  %v2118_v41 = vadd.f32 %v1961_v44, %v1929_v7 }
 0x12e   :  { %v898_v43 = vadd.f32 %v897_v61, %v2095_v23  ;;  %v2123_v61 = vadd.f32 %v1959_v42, %v1931_v10 }
 0x12f   :  { %3105 = vst [vmem:[#allocation35_spill] sm:$0xff] %v2099_v22  ;;  %v935_v31 = vadd.f32 %v934_v58, %v2099_v22  ;;  %v2128_v58 = vadd.f32 %v1961_v44, %v1933_v11  ;;  %v2158_v22 = vadd.f32 %v1961_v44, %v1945_v25 }
 0x130   :  { %v899_v53 = vadd.f32 %v898_v43, %v2103_v38  ;;  %v2133_v43 = vadd.f32 %v1959_v42, %v1935_v14 }
 0x131   :  { %v936_v2 = vadd.f32 %v935_v31, %v2108_v34  ;;  %v2138_v31 = vadd.f32 %v1961_v44, %v1937_v17  ;;  %v522_v34 = vpop.f32.mrf.mxu2 }
 0x132   :  { %v900_v3 = vadd.f32 %v899_v53, %v2113_v36  ;;  %v2143_v53 = vadd.f32 %v1959_v42, %v1939_v19  ;;  %v878_v62 = vadd.f32 %v1959_v42, %v522_v34 }
 0x133   :  { %v937_v6 = vadd.f32 %v936_v2, %v2118_v41  ;;  %v2148_v2 = vadd.f32 %v1961_v44, %v1941_v21 }
 0x134   :  { %v901_v7 = vadd.f32 %v900_v3, %v2123_v61  ;;  %v2153_v3 = vadd.f32 %v1959_v42, %v1943_v24 }
 0x135   :  { %v938_v10 = vadd.f32 %v937_v6, %v2128_v58  ;;  %v611_v6 = vpop.f32.mrf.mxu3 }
 0x136   :  { %v902_v11 = vadd.f32 %v901_v7, %v2133_v43  ;;  %v2163_v7 = vadd.f32 %v1959_v42, %v1947_v28 }
 0x137   :  { %v939_v14 = vadd.f32 %v938_v10, %v2138_v31  ;;  %v2168_v10 = vadd.f32 %v1961_v44, %v1949_v29 }
 0x138   :  { %v903_v17 = vadd.f32 %v902_v11, %v2143_v53  ;;  %v2173_v11 = vadd.f32 %v1959_v42, %v1951_v32 }
 0x139   :  { %v940_v19 = vadd.f32 %v939_v14, %v2148_v2  ;;  %v2178_v14 = vadd.f32 %v1961_v44, %v1953_v35  ;;  %v525_v60 = vpop.f32.mrf.mxu2 }
 0x13a   :  { %v904_v21 = vadd.f32 %v903_v17, %v2153_v3  ;;  %v2183_v17 = vadd.f32 %v1959_v42, %v1955_v37 }
 0x13b   :  { %v941_v24 = vadd.f32 %v940_v19, %v2158_v22  ;;  %v2188_v19 = vadd.f32 %v1961_v44, %v1957_v39  ;;  %v872_v39 = vadd.f32 %v1959_v42, %v2011_v5  ;;  %v876_v5 = vadd.f32 %v1959_v42, %v520_v40 }
 0x13c   :  { %v905_v25 = vadd.f32 %v904_v21, %v2163_v7  ;;  %v2193_v21 = vadd.f32 %v1959_v42, %v1963_v45  ;;  %v2206_v45 = vadd.f32 %v1961_v44, %v2025_v18 }
 0x13d   :  { %v942_v28 = vadd.f32 %v941_v24, %v2168_v10  ;;  %v2198_v24 = vadd.f32 %v1961_v44, %v1977_v50  ;;  %v614_v33 = vpop.f32.mrf.mxu3  ;;  %v874_v50 = vadd.f32 %v1959_v42, %v2055_v15 }
 0x13e   :  { %v906_v29 = vadd.f32 %v905_v25, %v2173_v11  ;;  %v1876_v25 = vmov 256.0   ;;  %v2229_v57 = vadd.f32 %v1961_v44, %v614_v33 }
 0x13f   :  { %v943_v32 = vadd.f32 %v942_v28, %v2178_v14  ;;  %1734 = vrcp.f32 %v1876_v25 }
 0x140   :  { %v907_v35 = vadd.f32 %v906_v29, %v2183_v17 }
 0x141   :  { %v944_v37 = vadd.f32 %v943_v32, %v2188_v19  ;;  %v2213_v32 = vadd.f32 %v1961_v44, %v2069_v27  ;;  %v527_v27 = vpop.f32.mrf.mxu2 }
 0x142   :  { %v908_v28 = vadd.f32 %v907_v35, %v2193_v21 }
 0x143   :  { %v945_v29 = vadd.f32 %v944_v37, %v2198_v24 }
 0x144   :  { %v909_v8 = vadd.f32 %v908_v28, %v872_v39  ;;  %v2224_v28 = vadd.f32 %v1961_v44, %v611_v6 }
 0x145   :  { %v946_v25 = vadd.f32 %v945_v29, %v2206_v45  ;;  %v1735_v13 = vpop.eup %1734  ;;  %v880_v29 = vadd.f32 %v1959_v42, %v525_v60 }
 0x146   :  { %v910_v35 = vadd.f32 %v909_v8, %v874_v50  ;;  %v959_v40 = vmul.f32 256.0, %v1735_v13  ;;  %vm963_vm0 = vweird.f32 %v1735_v13 }
 0x147   :  { %v947_v18 = vadd.f32 %v946_v25, %v2213_v32  ;;  %v882_v25 = vadd.f32 %v1959_v42, %v527_v27 }
 0x148   :  { %v911_v37 = vadd.f32 %v910_v35, %v876_v5  ;;  %v616_v35 = vpop.f32.mrf.mxu3  ;;  %v960_v26 = vsub.f32 1.0, %v959_v40 }
 0x149   :  { %v948_v15 = vadd.f32 %v947_v18, %v2218_v4  ;;  %v2234_v6 = vadd.f32 %v1961_v44, %v616_v35 }
 0x14a   :  { %v912_v12 = vadd.f32 %v911_v37, %v878_v62  ;;  %v961_v20 = vmul.f32 %v1735_v13, %v960_v26 }
 0x14b   :  { %v949_v8 = vadd.f32 %v948_v15, %v2224_v28 }
 0x14c   :  { %v913_v56 = vadd.f32 %v912_v12, %v880_v29  ;;  %v962_v47 = vadd.f32 %v1735_v13, %v961_v20 }
 0x14d   :  { %v950_v34 = vadd.f32 %v949_v8, %v2229_v57 }
 0x14e   :  { %v914_v18 = vadd.f32 %v913_v56, %v882_v25  ;;  %v2237_v51 = vsel %vm963_vm0, %v1735_v13, %v962_v47 }
 0x14f   :  { %v951_v60 = vadd.f32 %v950_v34, %v2234_v6 }
 0x150   :  { %v915_v37 = vrot.slane %v914_v18, 4 }
 0x151   :  { %v952_v30 = vrot.slane %v951_v60, 4 }
 0x152   :  { %v916_v52 = vadd.f32 %v915_v37, %v914_v18 }
 0x153   :  { %v953_v42 = vadd.f32 %v952_v30, %v951_v60 }
 0x154   :  { %v917_v15 = vrot.slane %v916_v52, 2 }
 0x155   :  { %v954_v44 = vrot.slane %v953_v42, 2 }
 0x156   :  { %v918_v33 = vadd.f32 %v917_v15, %v916_v52 }
 0x157   :  { %v955_v52 = vadd.f32 %v954_v44, %v953_v42 }
 0x158   :  { %v919_v12 = vrot.slane %v918_v33, 1 }
 0x15a   :  { %v920_v27 = vadd.f32 %v919_v12, %v918_v33 }
 0x15c   :  { %v2240_v56 = vmul.f32 %v2237_v51, %v920_v27 }
 0x15e   :  { %v2244_v40 = vsub.f32 %v2085_v1, %v2240_v56  ;;  %v2248_v26 = vsub.f32 %v2095_v23, %v2240_v56  ;;  %v2252_v20 = vsub.f32 %v2103_v38, %v2240_v56  ;;  %v2256_v47 = vsub.f32 %v2113_v36, %v2240_v56 }
 0x15f   :  { %v2260_v13 = vsub.f32 %v2123_v61, %v2240_v56  ;;  %v2264_v1 = vsub.f32 %v2133_v43, %v2240_v56  ;;  %v2268_v30 = vsub.f32 %v2143_v53, %v2240_v56  ;;  %v2272_v23 = vsub.f32 %v2153_v3, %v2240_v56 }
 0x160   :  { %v2276_v38 = vsub.f32 %v2163_v7, %v2240_v56  ;;  %v2280_v36 = vsub.f32 %v2173_v11, %v2240_v56  ;;  %v2284_v61 = vsub.f32 %v2183_v17, %v2240_v56  ;;  %v2288_v43 = vsub.f32 %v2193_v21, %v2240_v56 }
 0x161   :  { %v2291_v53 = vsub.f32 %v872_v39, %v2240_v56  ;;  %v2294_v3 = vsub.f32 %v874_v50, %v2240_v56  ;;  %v2297_v7 = vsub.f32 %v876_v5, %v2240_v56  ;;  %v2300_v11 = vsub.f32 %v878_v62, %v2240_v56 }
 0x162   :  { %v2303_v8 = vsub.f32 %v880_v29, %v2240_v56  ;;  %v2306_v17 = vsub.f32 %v882_v25, %v2240_v56  ;;  %v2310_v21 = vsub.f32 %v1972_v48, %v2240_v56  ;;  %v2314_v39 = vsub.f32 %v1966_v46, %v2240_v56 }
 0x163   :  { %v956_v50 = vrot.slane %v955_v52, 1  ;;  %v2318_v5 = vsub.f32 %v1975_v49, %v2240_v56  ;;  %v2326_v48 = vsub.f32 %v1988_v54, %v2240_v56  ;;  %v2330_v46 = vsub.f32 %v1997_v59, %v2240_v56 }
 0x164   :  { %v1031_v62 = vmul.f32 %v2310_v21, %v2310_v21  ;;  %v1033_v29 = vmul.f32 %v2314_v39, %v2314_v39  ;;  %v2334_v35 = vsub.f32 %v2005_v0, %v2240_v56  ;;  %v2338_v49 = vsub.f32 %v2015_v9, %v2240_v56 }
 0x165   :  { %v957_v25 = vadd.f32 %v956_v50, %v955_v52  ;;  %v1035_v34 = vmul.f32 %v2318_v5, %v2318_v5  ;;  %v1037_v54 = vmul.f32 %v2326_v48, %v2326_v48  ;;  %v2349_v60 = vsub.f32 %v2023_v16, %v2240_v56 }
 0x166   :  { %v1095_v18 = vadd.f32 %v1033_v29, %v1031_v62  ;;  %v2353_v0 = vsub.f32 %v2033_v55, %v2240_v56  ;;  %v1039_v9 = vmul.f32 %v2330_v46, %v2330_v46  ;;  %v1041_v15 = vmul.f32 %v2334_v35, %v2334_v35  ;;  %v3112_v29 = vld [vmem:[#allocation17_spill] sm:$0xff] }
 0x167   :  { %v2343_v37 = vmul.f32 %v2237_v51, %v957_v25  ;;  %v1043_v33 = vmul.f32 %v2338_v49, %v2338_v49  ;;  %v3114_v25 = vld [vmem:[#allocation16_spill] sm:$0xff] }
 0x168   :  { %v1096_v59 = vadd.f32 %v1095_v18, %v1035_v34  ;;  %v3116_v34 = vld [vmem:[#allocation26_spill] sm:$0xff] }
 0x169   :  { %v2363_v42 = vsub.f32 %v2118_v41, %v2343_v37  ;;  %v2367_v16 = vsub.f32 %v2128_v58, %v2343_v37  ;;  %v2371_v55 = vsub.f32 %v2138_v31, %v2343_v37  ;;  %v2375_v27 = vsub.f32 %v2148_v2, %v2343_v37 }
 0x16a   :  { %v1097_v12 = vadd.f32 %v1096_v59, %v1037_v54  ;;  %v2379_v52 = vsub.f32 %v2158_v22, %v2343_v37  ;;  %v2383_v41 = vsub.f32 %v2168_v10, %v2343_v37  ;;  %v2387_v58 = vsub.f32 %v2178_v14, %v2343_v37  ;;  %v3118_v54 = vld [vmem:[#allocation28_spill] sm:$0xff] }
 0x16b   :  { %3107 = vst [vmem:[#allocation37_spill] sm:$0xff] %v2375_v27  ;;  %v2391_v31 = vsub.f32 %v2188_v19, %v2343_v37  ;;  %v2395_v2 = vsub.f32 %v2198_v24, %v2343_v37  ;;  %v2399_v22 = vsub.f32 %v2206_v45, %v2343_v37  ;;  %v2403_v10 = vsub.f32 %v2213_v32, %v2343_v37 }
 0x16c   :  { %v1098_v44 = vadd.f32 %v1097_v12, %v1039_v9  ;;  %3108 = vst [vmem:[#allocation38_spill] sm:$0xff] %v2379_v52  ;;  %v2407_v14 = vsub.f32 %v2218_v4, %v2343_v37  ;;  %v2411_v19 = vsub.f32 %v2224_v28, %v2343_v37  ;;  %v2415_v24 = vsub.f32 %v2229_v57, %v2343_v37 }
 0x16d   :  { %v2419_v45 = vsub.f32 %v2041_v63, %v2240_v56  ;;  %v2423_v32 = vsub.f32 %v2234_v6, %v2343_v37  ;;  %v1045_v4 = vmul.f32 %v2349_v60, %v2349_v60  ;;  %v2429_v28 = vsub.f32 %v3112_v29, %v2343_v37 }
 0x16e   :  { %v1099_v50 = vadd.f32 %v1098_v44, %v1041_v15  ;;  %3109 = vst [vmem:[#allocation39_spill] sm:$0xff] %v2407_v14  ;;  %v2433_v57 = vsub.f32 %v3114_v25, %v2343_v37  ;;  %v2437_v63 = vsub.f32 %v3116_v34, %v2240_v56  ;;  %v1047_v6 = vmul.f32 %v2353_v0, %v2353_v0  ;;  %v3123_v34 = vld [vmem:[#allocation19_spill] sm:$0xff] }
 0x16f   :  { %3110 = vst [vmem:[#allocation40_spill] sm:$0xff] %v2411_v19  ;;  %v2443_v59 = vsub.f32 %v3118_v54, %v2240_v56  ;;  %v1049_v9 = vmul.f32 %v2419_v45, %v2419_v45  ;;  %v1032_v44 = vmul.f32 %v2429_v28, %v2429_v28 }
 0x170   :  { %3111 = vst [vmem:[#allocation41_spill] sm:$0xff] %v2419_v45  ;;  %v1100_v62 = vadd.f32 %v1099_v50, %v1043_v33  ;;  %v3120_v33 = vld [vmem:[#allocation18_spill] sm:$0xff]  ;;  %v1034_v50 = vmul.f32 %v2433_v57, %v2433_v57  ;;  %v1051_v29 = vmul.f32 %v2437_v63, %v2437_v63  ;;  %v3128_v45 = vld [vmem:[#allocation21_spill] sm:$0xff] }
 0x171   :  { %3113 = vst [vmem:[#allocation17_spill] sm:$0xff] %v2429_v28  ;;  %v2449_v12 = vsub.f32 %v3120_v33, %v2343_v37  ;;  %v1053_v33 = vmul.f32 %v2443_v59, %v2443_v59  ;;  %v3126_v28 = vld [vmem:[#allocation20_spill] sm:$0xff] }
 0x172   :  { %3115 = vst [vmem:[#allocation16_spill] sm:$0xff] %v2433_v57  ;;  %v1101_v18 = vadd.f32 %v1100_v62, %v1045_v4  ;;  %v3122_v4 = vld [vmem:[#allocation30_spill] sm:$0xff] }
 0x173   :  { %3117 = vst [vmem:[#allocation26_spill] sm:$0xff] %v2437_v63  ;;  %v2457_v62 = vsub.f32 %v3122_v4, %v2240_v56  ;;  %v2473_v4 = vsub.f32 %v3126_v28, %v2343_v37  ;;  %v1036_v63 = vmul.f32 %v2449_v12, %v2449_v12 }
 0x174   :  { %3119 = vst [vmem:[#allocation28_spill] sm:$0xff] %v2443_v59  ;;  %v1102_v15 = vadd.f32 %v1101_v18, %v1047_v6  ;;  %v2463_v6 = vsub.f32 %v3123_v34, %v2343_v37  ;;  %v3125_v18 = vld [vmem:[#allocation32_spill] sm:$0xff]  ;;  %v3130_v59 = vld [vmem:[#allocation22_spill] sm:$0xff] }
 0x175   :  { %3121 = vst [vmem:[#allocation18_spill] sm:$0xff] %v2449_v12  ;;  %v2467_v54 = vsub.f32 %v3125_v18, %v2240_v56  ;;  %v2481_v56 = vsub.f32 %v3128_v45, %v2343_v37  ;;  %v2489_v12 = vsub.f32 %v3130_v59, %v2343_v37  ;;  %v1059_v45 = vmul.f32 %v2244_v40, %v2244_v40 }
 0x176   :  { %v1103_v25 = vadd.f32 %v1102_v15, %v1049_v9  ;;  %3124 = vst [vmem:[#allocation30_spill] sm:$0xff] %v2463_v6  ;;  %v1132_v9 = vadd.f32 %v1034_v50, %v1032_v44  ;;  %v1055_v15 = vmul.f32 %v2457_v62, %v2457_v62  ;;  %v1038_v18 = vmul.f32 %v2463_v6, %v2463_v6 }
 0x177   :  { %3127 = vst [vmem:[#allocation19_spill] sm:$0xff] %v2473_v4  ;;  %v1057_v28 = vmul.f32 %v2467_v54, %v2467_v54  ;;  %v1040_v44 = vmul.f32 %v2473_v4, %v2473_v4  ;;  %v1061_v59 = vmul.f32 %v2248_v26, %v2248_v26 }
 0x178   :  { %v1104_v57 = vadd.f32 %v1103_v25, %v1051_v29  ;;  %3129 = vst [vmem:[#allocation32_spill] sm:$0xff] %v2481_v56  ;;  %v1133_v29 = vadd.f32 %v1132_v9, %v1036_v63  ;;  %v1042_v63 = vmul.f32 %v2481_v56, %v2481_v56 }
 0x179   :  { %3131 = vst [vmem:[#allocation20_spill] sm:$0xff] %v2489_v12 }
 0x17a   :  { %v1105_v34 = vadd.f32 %v1104_v57, %v1053_v33  ;;  %v1134_v57 = vadd.f32 %v1133_v29, %v1038_v18  ;;  %v3132_v33 = vld [vmem:[#allocation23_spill] sm:$0xff]  ;;  %v1044_v18 = vmul.f32 %v2489_v12, %v2489_v12 }
 0x17b   :  { %v2497_v6 = vsub.f32 %v3132_v33, %v2343_v37  ;;  %v3136_v33 = vld [vmem:[#allocation25_spill] sm:$0xff] }
 0x17c   :  { %v1106_v25 = vadd.f32 %v1105_v34, %v1055_v15  ;;  %v1135_v9 = vadd.f32 %v1134_v57, %v1040_v44  ;;  %v3134_v34 = vld [vmem:[#allocation24_spill] sm:$0xff]  ;;  %v2513_v56 = vsub.f32 %v3136_v33, %v2343_v37  ;;  %v3140_v33 = vld [vmem:[#allocation29_spill] sm:$0xff] }
 0x17d   :  { %3133 = vst [vmem:[#allocation21_spill] sm:$0xff] %v2497_v6  ;;  %v2505_v4 = vsub.f32 %v3134_v34, %v2343_v37  ;;  %v1046_v44 = vmul.f32 %v2497_v6, %v2497_v6  ;;  %v3138_v34 = vld [vmem:[#allocation27_spill] sm:$0xff]  ;;  %v2529_v6 = vsub.f32 %v3140_v33, %v2343_v37  ;;  %v3144_v33 = vld [vmem:[#allocation33_spill] sm:$0xff] }
 0x17e   :  { %v1107_v50 = vadd.f32 %v1106_v25, %v1057_v28  ;;  %v1136_v29 = vadd.f32 %v1135_v9, %v1042_v63  ;;  %v1063_v28 = vmul.f32 %v2252_v20, %v2252_v20  ;;  %3137 = vst [vmem:[#allocation23_spill] sm:$0xff] %v2513_v56  ;;  %v2521_v12 = vsub.f32 %v3138_v34, %v2343_v37  ;;  %v3142_v34 = vld [vmem:[#allocation31_spill] sm:$0xff] }
 0x17f   :  { %3135 = vst [vmem:[#allocation22_spill] sm:$0xff] %v2505_v4  ;;  %v1048_v63 = vmul.f32 %v2505_v4, %v2505_v4  ;;  %v2537_v4 = vsub.f32 %v3142_v34, %v2343_v37  ;;  %v3145_v34 = vld [vmem:[#allocation34_spill] sm:$0xff] }
 0x180   :  { %v1108_v15 = vadd.f32 %v1107_v50, %v1059_v45  ;;  %v1137_v57 = vadd.f32 %v1136_v29, %v1044_v18  ;;  %v1065_v45 = vmul.f32 %v2256_v47, %v2256_v47  ;;  %3139 = vst [vmem:[#allocation24_spill] sm:$0xff] %v2521_v12  ;;  %v1050_v18 = vmul.f32 %v2513_v56, %v2513_v56 }
 0x181   :  { %3141 = vst [vmem:[#allocation25_spill] sm:$0xff] %v2529_v6  ;;  %v2545_v56 = vsub.f32 %v3144_v33, %v2343_v37  ;;  %v3146_v33 = vld [vmem:[#allocation35_spill] sm:$0xff] }
 0x182   :  { %v1109_v25 = vadd.f32 %v1108_v15, %v1061_v59  ;;  %v1138_v9 = vadd.f32 %v1137_v57, %v1046_v44  ;;  %v1067_v59 = vmul.f32 %v2260_v13, %v2260_v13  ;;  %3143 = vst [vmem:[#allocation27_spill] sm:$0xff] %v2537_v4  ;;  %v1052_v44 = vmul.f32 %v2521_v12, %v2521_v12 }
 0x183   :  { %v2553_v12 = vsub.f32 %v3145_v34, %v2343_v37  ;;  %v3147_v34 = vld [vmem:[#allocation36_spill] sm:$0xff] }
 0x184   :  { %v1110_v50 = vadd.f32 %v1109_v25, %v1063_v28  ;;  %v1139_v29 = vadd.f32 %v1138_v9, %v1048_v63  ;;  %v1069_v28 = vmul.f32 %v2264_v1, %v2264_v1  ;;  %v1054_v63 = vmul.f32 %v2529_v6, %v2529_v6 }
 0x185   :  { %v2561_v6 = vsub.f32 %v3146_v33, %v2343_v37 }
 0x186   :  { %v1111_v15 = vadd.f32 %v1110_v50, %v1065_v45  ;;  %v1140_v57 = vadd.f32 %v1139_v29, %v1050_v18  ;;  %v1071_v45 = vmul.f32 %v2268_v30, %v2268_v30  ;;  %v1056_v18 = vmul.f32 %v2537_v4, %v2537_v4 }
 0x187   :  { %v2569_v4 = vsub.f32 %v3147_v34, %v2343_v37  ;;  %v1062_v33 = vmul.f32 %v2561_v6, %v2561_v6  ;;  %v1083_v34 = vmul.f32 %v2291_v53, %v2291_v53 }
 0x188   :  { %v1112_v25 = vadd.f32 %v1111_v15, %v1067_v59  ;;  %v1141_v9 = vadd.f32 %v1140_v57, %v1052_v44  ;;  %v1073_v59 = vmul.f32 %v2272_v23, %v2272_v23  ;;  %v1058_v44 = vmul.f32 %v2545_v56, %v2545_v56 }
 0x189   :  { %v1064_v37 = vmul.f32 %v2569_v4, %v2569_v4 }
 0x18a   :  { %v1113_v50 = vadd.f32 %v1112_v25, %v1069_v28  ;;  %v1142_v29 = vadd.f32 %v1141_v9, %v1054_v63  ;;  %v1075_v28 = vmul.f32 %v2276_v38, %v2276_v38  ;;  %v1060_v63 = vmul.f32 %v2553_v12, %v2553_v12 }
 0x18c   :  { %v1114_v15 = vadd.f32 %v1113_v50, %v1071_v45  ;;  %v1143_v57 = vadd.f32 %v1142_v29, %v1056_v18  ;;  %v1077_v45 = vmul.f32 %v2280_v36, %v2280_v36  ;;  %v1081_v29 = vmul.f32 %v2288_v43, %v2288_v43 }
 0x18e   :  { %v1115_v25 = vadd.f32 %v1114_v15, %v1073_v59  ;;  %v1144_v9 = vadd.f32 %v1143_v57, %v1058_v44  ;;  %v1079_v59 = vmul.f32 %v2284_v61, %v2284_v61  ;;  %v1066_v57 = vmul.f32 %v2363_v42, %v2363_v42 }
 0x190   :  { %v1116_v50 = vadd.f32 %v1115_v25, %v1075_v28  ;;  %v1145_v18 = vadd.f32 %v1144_v9, %v1060_v63  ;;  %v1068_v9 = vmul.f32 %v2367_v16, %v2367_v16 }
 0x192   :  { %v1117_v15 = vadd.f32 %v1116_v50, %v1077_v45  ;;  %v1146_v25 = vadd.f32 %v1145_v18, %v1062_v33  ;;  %v1085_v50 = vmul.f32 %v2294_v3, %v2294_v3  ;;  %v1070_v18 = vmul.f32 %v2371_v55, %v2371_v55 }
 0x194   :  { %v1118_v28 = vadd.f32 %v1117_v15, %v1079_v59  ;;  %v1147_v45 = vadd.f32 %v1146_v25, %v1064_v37  ;;  %v1087_v15 = vmul.f32 %v2297_v7, %v2297_v7  ;;  %v1072_v25 = vmul.f32 %v2375_v27, %v2375_v27 }
 0x196   :  { %v1119_v44 = vadd.f32 %v1118_v28, %v1081_v29  ;;  %v1148_v59 = vadd.f32 %v1147_v45, %v1066_v57  ;;  %v1089_v28 = vmul.f32 %v2300_v11, %v2300_v11  ;;  %v1074_v45 = vmul.f32 %v2379_v52, %v2379_v52 }
 0x198   :  { %v1120_v63 = vadd.f32 %v1119_v44, %v1083_v34  ;;  %v1149_v29 = vadd.f32 %v1148_v59, %v1068_v9  ;;  %v1091_v44 = vmul.f32 %v2303_v8, %v2303_v8  ;;  %v1076_v59 = vmul.f32 %v2383_v41, %v2383_v41 }
 0x19a   :  { %v1121_v33 = vadd.f32 %v1120_v63, %v1085_v50  ;;  %v1150_v34 = vadd.f32 %v1149_v29, %v1070_v18  ;;  %v1093_v63 = vmul.f32 %v2306_v17, %v2306_v17  ;;  %v1078_v18 = vmul.f32 %v2387_v58, %v2387_v58 }
 0x19c   :  { %v1122_v37 = vadd.f32 %v1121_v33, %v1087_v15  ;;  %v1151_v50 = vadd.f32 %v1150_v34, %v1072_v25  ;;  %v1082_v25 = vmul.f32 %v2395_v2, %v2395_v2 }
 0x19e   :  { %v1123_v57 = vadd.f32 %v1122_v37, %v1089_v28  ;;  %v1152_v15 = vadd.f32 %v1151_v50, %v1074_v45  ;;  %v1080_v28 = vmul.f32 %v2391_v31, %v2391_v31 }
 0x1a0   :  { %v1124_v9 = vadd.f32 %v1123_v57, %v1091_v44  ;;  %v1153_v29 = vadd.f32 %v1152_v15, %v1076_v59  ;;  %v1084_v57 = vmul.f32 %v2399_v22, %v2399_v22  ;;  %v1088_v15 = vmul.f32 %v2407_v14, %v2407_v14 }
 0x1a2   :  { %v1125_v33 = vadd.f32 %v1124_v9, %v1093_v63  ;;  %v1154_v37 = vadd.f32 %v1153_v29, %v1078_v18  ;;  %v1086_v63 = vmul.f32 %v2403_v10, %v2403_v10 }
 0x1a4   :  { %v1126_v27 = vrot.slane %v1125_v33, 4  ;;  %v1155_v34 = vadd.f32 %v1154_v37, %v1080_v28  ;;  %v1092_v37 = vmul.f32 %v2415_v24, %v2415_v24 }
 0x1a6   :  { %v1127_v52 = vadd.f32 %v1126_v27, %v1125_v33  ;;  %v1156_v45 = vadd.f32 %v1155_v34, %v1082_v25  ;;  %v1090_v33 = vmul.f32 %v2411_v19, %v2411_v19  ;;  %v1094_v34 = vmul.f32 %v2423_v32, %v2423_v32 }
 0x1a8   :  { %v1128_v44 = vrot.slane %v1127_v52, 2  ;;  %v1157_v9 = vadd.f32 %v1156_v45, %v1084_v57 }
 0x1aa   :  { %v1129_v50 = vadd.f32 %v1128_v44, %v1127_v52  ;;  %v1158_v18 = vadd.f32 %v1157_v9, %v1086_v63 }
 0x1ac   :  { %v1130_v59 = vrot.slane %v1129_v50, 1  ;;  %v1159_v29 = vadd.f32 %v1158_v18, %v1088_v15 }
 0x1ae   :  { %v1131_v27 = vadd.f32 %v1130_v59, %v1129_v50  ;;  %v1160_v52 = vadd.f32 %v1159_v29, %v1090_v33  ;;  %v1257_v33 = vld [vmem:[%s3042_s3] sm:$0x3]  ;;  %s1877_s3 = smov [#allocation11]  }
 0x1af   :  { %s1529_s15 = sshll.u32 %s1877_s3, 4  ;;  %s1530_s15 = int_to_ptr.vmem [resolvable:$true] %s1529_s15 }
 0x1b0   :  { %v1169_v28 = vmul.f32 %v1131_v27, %v2237_v51  ;;  %v1161_v44 = vadd.f32 %v1160_v52, %v1092_v37 }
 0x1b2   :  { %v1171_v25 = vadd.f32 1e-05, %v1169_v28  ;;  %v1162_v57 = vadd.f32 %v1161_v44, %v1094_v34  ;;  %v1327_v28 = vld [vmem:[#allocation9] sm:$0x3]  ;;  %v2628_v34 = vperm.slane %v1257_v33, 0 }
 0x1b3   :  { %v2630_v44 = vperm.slane %v1327_v28, 0 }
 0x1b4   :  { %1736 = vrsqrt.f32 %v1171_v25  ;;  %v1163_v45 = vrot.slane %v1162_v57, 4  ;;  %vm1179_vm2 = vweird.f32 %v1171_v25 }
 0x1b6   :  { %v1164_v63 = vadd.f32 %v1163_v45, %v1162_v57  ;;  %v2632_v57 = vperm.slane %v1257_v33, 1  ;;  %v2634_v45 = vperm.slane %v1327_v28, 1  ;;  %v3148_v33 = vld [vmem:[#allocation41_spill] sm:$0xff] }
 0x1b8   :  { %v1165_v9 = vrot.slane %v1164_v63, 2 }
 0x1ba   :  { %v1737_v50 = vpop.eup %1736  ;;  %v1166_v19 = vadd.f32 %v1165_v9, %v1164_v63 }
 0x1bb   :  { %v1174_v59 = vmul.f32 %v1737_v50, %v1171_v25  ;;  %vm1180_vm1 = vweird.f32 %v1737_v50 }
 0x1bc   :  { %v1167_v18 = vrot.slane %v1166_v19, 1  ;;  %vm1181_vm3 = vmor %vm1179_vm2, %vm1180_vm1 }
 0x1bd   :  { %v1175_v15 = vmul.f32 %v1737_v50, %v1174_v59 }
 0x1be   :  { %v1168_v14 = vadd.f32 %v1167_v18, %v1166_v19 }
 0x1bf   :  { %v1176_v27 = vmul.f32 0.5, %v1175_v15 }
 0x1c0   :  { %v1170_v37 = vmul.f32 %v1168_v14, %v2237_v51 }
 0x1c1   :  { %v1177_v29 = vsub.f32 1.5, %v1176_v27 }
 0x1c2   :  { %v2639_v15 = vadd.f32 1e-05, %v1170_v37  ;;  %v3150_v37 = vld [vmem:[#allocation28_spill] sm:$0xff] }
 0x1c3   :  { %v1178_v52 = vmul.f32 %v1737_v50, %v1177_v29  ;;  %v3149_v29 = vld [vmem:[#allocation26_spill] sm:$0xff] }
 0x1c4   :  { %1738 = vrsqrt.f32 %v2639_v15  ;;  %vm1189_vm4 = vweird.f32 %v2639_v15 }
 0x1c5   :  { %v1182_v19 = vsel %vm1181_vm3, %v1737_v50, %v1178_v52 }
 0x1c6   :  { %v1255_v63 = vmul.f32 %v1182_v19, %v2306_v17  ;;  %v1193_v9 = vmul.f32 %v1182_v19, %v2310_v21  ;;  %v1195_v59 = vmul.f32 %v1182_v19, %v2314_v39  ;;  %v1197_v51 = vmul.f32 %v1182_v19, %v2318_v5 }
 0x1c7   :  { %v1199_v14 = vmul.f32 %v1182_v19, %v2326_v48  ;;  %v1201_v25 = vmul.f32 %v1182_v19, %v2330_v46  ;;  %v1203_v18 = vmul.f32 %v1182_v19, %v2334_v35  ;;  %v1205_v50 = vmul.f32 %v1182_v19, %v2338_v49 }
 0x1c8   :  { %v1325_v27 = vmul.f32 %v2628_v34, %v1255_v63  ;;  %v1207_v17 = vmul.f32 %v1182_v19, %v2349_v60  ;;  %v1209_v21 = vmul.f32 %v1182_v19, %v2353_v0  ;;  %v1211_v39 = vmul.f32 %v1182_v19, %v3148_v33 }
 0x1c9   :  { %v1213_v28 = vmul.f32 %v1182_v19, %v3149_v29  ;;  %v1215_v5 = vmul.f32 %v1182_v19, %v3150_v37  ;;  %v1217_v48 = vmul.f32 %v1182_v19, %v2457_v62  ;;  %v1219_v35 = vmul.f32 %v1182_v19, %v2467_v54 }
 0x1ca   :  { %v2654_v46 = vadd.f32 %v2630_v44, %v1325_v27  ;;  %v1221_v52 = vmul.f32 %v1182_v19, %v2244_v40  ;;  %v1223_v49 = vmul.f32 %v1182_v19, %v2248_v26  ;;  %v1225_v60 = vmul.f32 %v1182_v19, %v2252_v20 }
 0x1cb   :  { %v1227_v0 = vmul.f32 %v1182_v19, %v2256_v47  ;;  %v1229_v63 = vmul.f32 %v1182_v19, %v2260_v13  ;;  %v1231_v33 = vmul.f32 %v1182_v19, %v2264_v1  ;;  %v1233_v62 = vmul.f32 %v1182_v19, %v2268_v30 }
 0x1cc   :  { %v1235_v27 = vmul.f32 %v1182_v19, %v2272_v23  ;;  %v1237_v54 = vmul.f32 %v1182_v19, %v2276_v38  ;;  %v1239_v40 = vmul.f32 %v1182_v19, %v2280_v36  ;;  %v1241_v26 = vmul.f32 %v1182_v19, %v2284_v61 }
 0x1cd   :  { %v1243_v20 = vmul.f32 %v1182_v19, %v2288_v43  ;;  %v1245_v47 = vmul.f32 %v1182_v19, %v2291_v53  ;;  %v1247_v13 = vmul.f32 %v1182_v19, %v2294_v3  ;;  %v1249_v1 = vmul.f32 %v1182_v19, %v2297_v7 }
 0x1ce   :  { %v1251_v37 = vmul.f32 %v1182_v19, %v2300_v11  ;;  %v1253_v30 = vmul.f32 %v1182_v19, %v2303_v8  ;;  %v1263_v23 = vmul.f32 %v2628_v34, %v1193_v9  ;;  %v1265_v38 = vmul.f32 %v2628_v34, %v1195_v59 }
 0x1cf   :  { %v1267_v36 = vmul.f32 %v2628_v34, %v1197_v51  ;;  %v1269_v61 = vmul.f32 %v2628_v34, %v1199_v14  ;;  %v1271_v43 = vmul.f32 %v2628_v34, %v1201_v25  ;;  %v1273_v53 = vmul.f32 %v2628_v34, %v1203_v18 }
 0x1d0   :  { %v1275_v3 = vmul.f32 %v2628_v34, %v1205_v50  ;;  %v1277_v7 = vmul.f32 %v2628_v34, %v1207_v17  ;;  %v1279_v11 = vmul.f32 %v2628_v34, %v1209_v21  ;;  %v1281_v8 = vmul.f32 %v2628_v34, %v1211_v39  ;;  %v1739_v21 = vpop.eup %1738 }
 0x1d1   :  { %v1283_v19 = vmul.f32 %v2628_v34, %v1213_v28  ;;  %v1285_v9 = vmul.f32 %v2628_v34, %v1215_v5  ;;  %v1287_v59 = vmul.f32 %v2628_v34, %v1217_v48  ;;  %v1289_v51 = vmul.f32 %v2628_v34, %v1219_v35 }
 0x1d2   :  { %v1291_v14 = vmul.f32 %v2628_v34, %v1221_v52  ;;  %v1293_v25 = vmul.f32 %v2628_v34, %v1223_v49  ;;  %v1295_v18 = vmul.f32 %v2628_v34, %v1225_v60  ;;  %v1297_v50 = vmul.f32 %v2628_v34, %v1227_v0 }
 0x1d3   :  { %v1299_v17 = vmul.f32 %v2628_v34, %v1229_v63  ;;  %v1301_v39 = vmul.f32 %v2628_v34, %v1231_v33  ;;  %v1303_v28 = vmul.f32 %v2628_v34, %v1233_v62  ;;  %v1305_v5 = vmul.f32 %v2628_v34, %v1235_v27 }
 0x1d4   :  { %v1307_v48 = vmul.f32 %v2628_v34, %v1237_v54  ;;  %v1184_v35 = vmul.f32 %v1739_v21, %v2639_v15  ;;  %vm1190_vm5 = vweird.f32 %v1739_v21  ;;  %v1309_v52 = vmul.f32 %v2628_v34, %v1239_v40 }
 0x1d5   :  { %v1311_v49 = vmul.f32 %v2628_v34, %v1241_v26  ;;  %v1313_v60 = vmul.f32 %v2628_v34, %v1243_v20  ;;  %v1315_v0 = vmul.f32 %v2628_v34, %v1245_v47  ;;  %v1317_v63 = vmul.f32 %v2628_v34, %v1247_v13  ;;  %vm1191_vm6 = vmor %vm1189_vm4, %vm1190_vm5 }
 0x1d6   :  { %v1319_v33 = vmul.f32 %v2628_v34, %v1249_v1  ;;  %v1185_v62 = vmul.f32 %v1739_v21, %v1184_v35  ;;  %v2708_v27 = vmul.f32 %v2628_v34, %v1251_v37  ;;  %v2711_v54 = vmul.f32 %v2628_v34, %v1253_v30  ;;  %v3166_v35 = vld [vmem:[#allocation17_spill] sm:$0xff] }
 0x1d7   :  { %v2714_v29 = vadd.f32 %v2630_v44, %v1263_v23  ;;  %v2717_v40 = vadd.f32 %v2630_v44, %v1265_v38  ;;  %v2720_v26 = vadd.f32 %v2630_v44, %v1267_v36  ;;  %v2723_v20 = vadd.f32 %v2630_v44, %v1269_v61 }
 0x1d8   :  { %v2726_v47 = vadd.f32 %v2630_v44, %v1271_v43  ;;  %v1186_v13 = vmul.f32 0.5, %v1185_v62  ;;  %v2729_v1 = vadd.f32 %v2630_v44, %v1273_v53  ;;  %v2732_v34 = vadd.f32 %v2630_v44, %v1275_v3  ;;  %v3167_v62 = vld [vmem:[#allocation16_spill] sm:$0xff] }
 0x1d9   :  { %v2735_v37 = vadd.f32 %v2630_v44, %v1277_v7  ;;  %v2738_v30 = vadd.f32 %v2630_v44, %v1279_v11  ;;  %v2741_v23 = vadd.f32 %v2630_v44, %v1281_v8  ;;  %v2744_v38 = vadd.f32 %v2630_v44, %v1283_v19 }
 0x1da   :  { %v2747_v36 = vadd.f32 %v2630_v44, %v1285_v9  ;;  %v1187_v61 = vsub.f32 1.5, %v1186_v13  ;;  %v2750_v43 = vadd.f32 %v2630_v44, %v1287_v59  ;;  %v2753_v53 = vadd.f32 %v2630_v44, %v1289_v51  ;;  %v3168_v13 = vld [vmem:[#allocation18_spill] sm:$0xff] }
 0x1db   :  { %v2756_v3 = vadd.f32 %v2630_v44, %v1291_v14  ;;  %v2759_v7 = vadd.f32 %v2630_v44, %v1293_v25  ;;  %v2762_v11 = vadd.f32 %v2630_v44, %v1295_v18  ;;  %v2765_v8 = vadd.f32 %v2630_v44, %v1297_v50 }
 0x1dc   :  { %v2768_v19 = vadd.f32 %v2630_v44, %v1299_v17  ;;  %v1188_v9 = vmul.f32 %v1739_v21, %v1187_v61  ;;  %v2771_v59 = vadd.f32 %v2630_v44, %v1301_v39  ;;  %v2774_v51 = vadd.f32 %v2630_v44, %v1303_v28 }
 0x1dd   :  { %3151 = vst [vmem:[#allocation29_spill] sm:$0xff] %v2756_v3  ;;  %v2777_v14 = vadd.f32 %v2630_v44, %v1305_v5  ;;  %v2783_v25 = vadd.f32 %v2630_v44, %v1307_v48  ;;  %v2786_v18 = vadd.f32 %v2630_v44, %v1309_v52  ;;  %v2789_v50 = vadd.f32 %v2630_v44, %v1311_v49 }
 0x1de   :  { %3152 = vst [vmem:[#allocation31_spill] sm:$0xff] %v2759_v7  ;;  %v2792_v17 = vadd.f32 %v2630_v44, %v1313_v60  ;;  %v1192_v39 = vsel %vm1191_vm6, %v1739_v21, %v1188_v9  ;;  %v2795_v28 = vadd.f32 %v2630_v44, %v1315_v0  ;;  %v2798_v5 = vadd.f32 %v2630_v44, %v1317_v63  ;;  %v3169_v60 = vld [vmem:[#allocation30_spill] sm:$0xff]  ;;  %v3170_v21 = vld [vmem:[#allocation19_spill] sm:$0xff]  ;;  %v3171_v0 = vld [vmem:[#allocation32_spill] sm:$0xff] }
 0x1df   :  { %3153 = vst [vmem:[#allocation33_spill] sm:$0xff] %v2762_v11  ;;  %v2801_v15 = vadd.f32 %v2630_v44, %v1319_v33  ;;  %v1256_v48 = vmul.f32 %v1192_v39, %v2423_v32  ;;  %v1194_v52 = vmul.f32 %v1192_v39, %v3166_v35  ;;  %v1196_v49 = vmul.f32 %v1192_v39, %v3167_v62  ;;  %v3173_v33 = vld [vmem:[#allocation21_spill] sm:$0xff]  ;;  %v3182_v7 = vld [vmem:[#allocation39_spill] sm:$0xff] }
 0x1e0   :  { %3154 = vst [vmem:[#allocation34_spill] sm:$0xff] %v2765_v8  ;;  %v1198_v61 = vmul.f32 %v1192_v39, %v3168_v13  ;;  %v1202_v9 = vmul.f32 %v1192_v39, %v3170_v21  ;;  %v1220_v21 = vmul.f32 %v1192_v39, %v2545_v56  ;;  %v1238_v56 = vmul.f32 %v1192_v39, %v2383_v41 }
 0x1e1   :  { %3155 = vst [vmem:[#allocation35_spill] sm:$0xff] %v2768_v19  ;;  %v3179_v19 = vld [vmem:[#allocation37_spill] sm:$0xff]  ;;  %v1264_v41 = vmul.f32 %v2632_v57, %v1194_v52 }
 0x1e2   :  { %3156 = vst [vmem:[#allocation36_spill] sm:$0xff] %v2771_v59  ;;  %v3178_v59 = vld [vmem:[#allocation27_spill] sm:$0xff] }
 0x1e3   :  { %3157 = vst [vmem:[#allocation41_spill] sm:$0xff] %v2774_v51  ;;  %v3177_v51 = vld [vmem:[#allocation25_spill] sm:$0xff] }
 0x1e4   :  { %3158 = vst [vmem:[#allocation26_spill] sm:$0xff] %v2777_v14  ;;  %v3176_v14 = vld [vmem:[#allocation24_spill] sm:$0xff]  ;;  %v1216_v13 = vmul.f32 %v1192_v39, %v3177_v51  ;;  %v1234_v51 = vmul.f32 %v1192_v39, %v3179_v19  ;;  %v1250_v19 = vmul.f32 %v1192_v39, %v3182_v7 }
 0x1e5   :  { %3159 = vst [vmem:[#allocation28_spill] sm:$0xff] %v2783_v25  ;;  %v3175_v25 = vld [vmem:[#allocation23_spill] sm:$0xff]  ;;  %v1214_v62 = vmul.f32 %v1192_v39, %v3176_v14  ;;  %v1232_v14 = vmul.f32 %v1192_v39, %v2371_v55 }
 0x1e6   :  { %3160 = vst [vmem:[#allocation42_spill] sm:$0xff] %v2786_v18  ;;  %v3174_v18 = vld [vmem:[#allocation22_spill] sm:$0xff]  ;;  %v1212_v35 = vmul.f32 %v1192_v39, %v3175_v25  ;;  %v1230_v25 = vmul.f32 %v1192_v39, %v2367_v16  ;;  %v3181_v16 = vmax.f32 %v2654_v46, 0.0  ;;  %v1286_v52 = vmul.f32 %v2632_v57, %v1216_v13 }
 0x1e7   :  { %3161 = vst [vmem:[#allocation43_spill] sm:$0xff] %v2789_v50  ;;  %v3172_v50 = vld [vmem:[#allocation20_spill] sm:$0xff]  ;;  %v1210_v32 = vmul.f32 %v1192_v39, %v3174_v18  ;;  %v1228_v18 = vmul.f32 %v1192_v39, %v2363_v42  ;;  %v1248_v42 = vmul.f32 %v1192_v39, %v2403_v10  ;;  %v1308_v13 = vmul.f32 %v2632_v57, %v1238_v56 }
 0x1e8   :  { %3162 = vst [vmem:[#allocation44_spill] sm:$0xff] %v2792_v17  ;;  %v1200_v17 = vmul.f32 %v1192_v39, %v3169_v60  ;;  %v1206_v63 = vmul.f32 %v1192_v39, %v3172_v50  ;;  %v1218_v60 = vmul.f32 %v1192_v39, %v3178_v59  ;;  %v1222_v50 = vmul.f32 %v1192_v39, %v2553_v12  ;;  %v3180_v59 = vld [vmem:[#allocation38_spill] sm:$0xff] }
 0x1e9   :  { %3163 = vst [vmem:[#allocation45_spill] sm:$0xff] %v2795_v28  ;;  %v1204_v28 = vmul.f32 %v1192_v39, %v3171_v0  ;;  %v1236_v11 = vmul.f32 %v1192_v39, %v3180_v59  ;;  %v1242_v12 = vmul.f32 %v1192_v39, %v2391_v31  ;;  %v1254_v59 = vmul.f32 %v1192_v39, %v2415_v24 }
 0x1ea   :  { %3164 = vst [vmem:[#allocation46_spill] sm:$0xff] %v2798_v5  ;;  %v1326_v5 = vmul.f32 %v2632_v57, %v1256_v48  ;;  %v1224_v48 = vmul.f32 %v1192_v39, %v2561_v6  ;;  %v1244_v6 = vmul.f32 %v1192_v39, %v2395_v2  ;;  %v1268_v31 = vmul.f32 %v2632_v57, %v1198_v61 }
 0x1eb   :  { %3165 = vst [vmem:[#allocation47_spill] sm:$0xff] %v2801_v15  ;;  %v1208_v15 = vmul.f32 %v1192_v39, %v3173_v33  ;;  %v1226_v33 = vmul.f32 %v1192_v39, %v2569_v4  ;;  %v1246_v4 = vmul.f32 %v1192_v39, %v2399_v22  ;;  %v1270_v2 = vmul.f32 %v2632_v57, %v1200_v17 }
 0x1ec   :  { %v1396_v0 = vadd.f32 %v2634_v45, %v1326_v5  ;;  %v1240_v5 = vmul.f32 %v1192_v39, %v2387_v58  ;;  %v1266_v58 = vmul.f32 %v2632_v57, %v1196_v49  ;;  %v1272_v22 = vmul.f32 %v2632_v57, %v1202_v9 }
 0x1ed   :  { %v1274_v10 = vmul.f32 %v2632_v57, %v1204_v28  ;;  %v1276_v46 = vmul.f32 %v2632_v57, %v1206_v63  ;;  %v1278_v7 = vmul.f32 %v2632_v57, %v1208_v15  ;;  %v1282_v24 = vmul.f32 %v2632_v57, %v1212_v35 }
 0x1ee   :  { %v1460_v8 = vmax.f32 %v1396_v0, 0.0  ;;  %v3183_v0 = vld [vmem:[#allocation40_spill] sm:$0xff]  ;;  %v1288_v49 = vmul.f32 %v2632_v57, %v1218_v60  ;;  %v1290_v17 = vmul.f32 %v2632_v57, %v1220_v21  ;;  %v1292_v61 = vmul.f32 %v2632_v57, %v1222_v50 }
 0x1ef   :  { %v1252_v3 = vmul.f32 %v1192_v39, %v3183_v0  ;;  %v1284_v39 = vmul.f32 %v2632_v57, %v1214_v62  ;;  %v1294_v28 = vmul.f32 %v2632_v57, %v1224_v48  ;;  %v1296_v9 = vmul.f32 %v2632_v57, %v1226_v33 }
 0x1f0   :  { %v1492_v55 = vpack.c.bf16 %v1460_v8, %v3181_v16  ;;  %v1280_v8 = vmul.f32 %v2632_v57, %v1210_v32  ;;  %v1298_v15 = vmul.f32 %v2632_v57, %v1228_v18  ;;  %v1300_v63 = vmul.f32 %v2632_v57, %v1230_v25 }
 0x1f1   :  { %v1302_v32 = vmul.f32 %v2632_v57, %v1232_v14  ;;  %v1304_v35 = vmul.f32 %v2632_v57, %v1234_v51  ;;  %v1306_v62 = vmul.f32 %v2632_v57, %v1236_v11  ;;  %v1310_v60 = vmul.f32 %v2632_v57, %v1240_v5 }
 0x1f2   :  { %1524 = vst [vmem:[#allocation11 + $0xf8] sm:$0xff] %v1492_v55  ;;  %v1312_v21 = vmul.f32 %v2632_v57, %v1242_v12  ;;  %v1314_v50 = vmul.f32 %v2632_v57, %v1244_v6  ;;  %v1316_v48 = vmul.f32 %v2632_v57, %v1246_v4  ;;  %v1318_v33 = vmul.f32 %v2632_v57, %v1248_v42 }
 0x1f3   :  { %v1320_v18 = vmul.f32 %v2632_v57, %v1250_v19  ;;  %v1322_v25 = vmul.f32 %v2632_v57, %v1252_v3  ;;  %v1324_v14 = vmul.f32 %v2632_v57, %v1254_v59  ;;  %v2871_v11 = vadd.f32 %v2634_v45, %v1264_v41 }
 0x1f4   :  { %v2874_v51 = vadd.f32 %v2634_v45, %v1266_v58  ;;  %v2877_v56 = vadd.f32 %v2634_v45, %v1268_v31  ;;  %v2880_v5 = vadd.f32 %v2634_v45, %v1270_v2  ;;  %v2883_v12 = vadd.f32 %v2634_v45, %v1272_v22 }
 0x1f5   :  { %v2886_v6 = vadd.f32 %v2634_v45, %v1274_v10  ;;  %v2889_v57 = vadd.f32 %v2634_v45, %v1276_v46  ;;  %v2892_v3 = vadd.f32 %v2634_v45, %v1278_v7  ;;  %v2895_v4 = vadd.f32 %v2634_v45, %v1280_v8 }
 0x1f6   :  { %v2898_v42 = vadd.f32 %v2634_v45, %v1282_v24  ;;  %v2901_v16 = vadd.f32 %v2634_v45, %v1284_v39  ;;  %v2904_v55 = vadd.f32 %v2634_v45, %v1286_v52  ;;  %v2907_v19 = vadd.f32 %v2634_v45, %v1288_v49 }
 0x1f7   :  { %v2910_v0 = vadd.f32 %v2634_v45, %v1290_v17  ;;  %v2913_v59 = vadd.f32 %v2634_v45, %v1292_v61  ;;  %v2916_v41 = vadd.f32 %v2634_v45, %v1294_v28  ;;  %v2919_v58 = vadd.f32 %v2634_v45, %v1296_v9 }
 0x1f8   :  { %v2922_v31 = vadd.f32 %v2634_v45, %v1298_v15  ;;  %v2925_v2 = vadd.f32 %v2634_v45, %v1300_v63  ;;  %v2928_v22 = vadd.f32 %v2634_v45, %v1302_v32  ;;  %v2931_v10 = vadd.f32 %v2634_v45, %v1304_v35 }
 0x1f9   :  { %v2934_v46 = vadd.f32 %v2634_v45, %v1306_v62  ;;  %v2937_v7 = vadd.f32 %v2634_v45, %v1308_v13  ;;  %v2940_v8 = vadd.f32 %v2634_v45, %v1310_v60  ;;  %v2943_v24 = vadd.f32 %v2634_v45, %v1312_v21 }
 0x1fa   :  { %v2946_v39 = vadd.f32 %v2634_v45, %v1314_v50  ;;  %v2949_v52 = vadd.f32 %v2634_v45, %v1316_v48  ;;  %v2952_v49 = vadd.f32 %v2634_v45, %v1318_v33  ;;  %v2955_v17 = vadd.f32 %v2634_v45, %v1320_v18 }
 0x1fb   :  { %v2959_v61 = vadd.f32 %v2630_v44, %v2708_v27  ;;  %v2962_v28 = vadd.f32 %v2634_v45, %v1322_v25  ;;  %v2966_v9 = vadd.f32 %v2630_v44, %v2711_v54  ;;  %v2969_v15 = vadd.f32 %v2634_v45, %v1324_v14 }
 0x1fc   :  { %3184 = vst [vmem:[#allocation17_spill] sm:$0xff] %v2952_v49  ;;  %v1397_v63 = vmax.f32 %v2714_v29, 0.0  ;;  %v1398_v32 = vmax.f32 %v2871_v11, 0.0  ;;  %v1399_v35 = vmax.f32 %v2717_v40, 0.0  ;;  %v1400_v62 = vmax.f32 %v2874_v51, 0.0  ;;  %v3202_v49 = vld [vmem:[#allocation45_spill] sm:$0xff] }
 0x1fd   :  { %3185 = vst [vmem:[#allocation16_spill] sm:$0xff] %v2955_v17  ;;  %v1401_v27 = vmax.f32 %v2720_v26, 0.0  ;;  %v1402_v13 = vmax.f32 %v2877_v56, 0.0  ;;  %v1403_v60 = vmax.f32 %v2723_v20, 0.0  ;;  %v1404_v44 = vmax.f32 %v2880_v5, 0.0  ;;  %v3190_v56 = vld [vmem:[#allocation29_spill] sm:$0xff] }
 0x1fe   :  { %3186 = vst [vmem:[#allocation18_spill] sm:$0xff] %v2959_v61  ;;  %v1405_v54 = vmax.f32 %v2726_v47, 0.0  ;;  %v1406_v45 = vmax.f32 %v2883_v12, 0.0  ;;  %v1407_v29 = vmax.f32 %v2729_v1, 0.0  ;;  %v1408_v21 = vmax.f32 %v2886_v6, 0.0  ;;  %v3191_v12 = vld [vmem:[#allocation31_spill] sm:$0xff] }
 0x1ff   :  { %3187 = vst [vmem:[#allocation30_spill] sm:$0xff] %v2962_v28  ;;  %v1409_v40 = vmax.f32 %v2732_v34, 0.0  ;;  %v1410_v50 = vmax.f32 %v2889_v57, 0.0  ;;  %v1411_v26 = vmax.f32 %v2735_v37, 0.0  ;;  %v1412_v48 = vmax.f32 %v2892_v3, 0.0  ;;  %v3192_v57 = vld [vmem:[#allocation33_spill] sm:$0xff] }
 0x200   :  { %3188 = vst [vmem:[#allocation19_spill] sm:$0xff] %v2966_v9  ;;  %v1413_v20 = vmax.f32 %v2738_v30, 0.0  ;;  %v1414_v33 = vmax.f32 %v2895_v4, 0.0  ;;  %v1415_v47 = vmax.f32 %v2741_v23, 0.0  ;;  %v1416_v18 = vmax.f32 %v2898_v42, 0.0  ;;  %v3193_v4 = vld [vmem:[#allocation34_spill] sm:$0xff] }
 0x201   :  { %3189 = vst [vmem:[#allocation32_spill] sm:$0xff] %v2969_v15  ;;  %v1417_v1 = vmax.f32 %v2744_v38, 0.0  ;;  %v1418_v25 = vmax.f32 %v2901_v16, 0.0  ;;  %v1419_v34 = vmax.f32 %v2747_v36, 0.0  ;;  %v1420_v14 = vmax.f32 %v2904_v55, 0.0  ;;  %v3194_v16 = vld [vmem:[#allocation35_spill] sm:$0xff] }
 0x202   :  { %v1421_v37 = vmax.f32 %v2750_v43, 0.0  ;;  %v1422_v11 = vmax.f32 %v2907_v19, 0.0  ;;  %v1423_v30 = vmax.f32 %v2753_v53, 0.0  ;;  %v1424_v51 = vmax.f32 %v2910_v0, 0.0  ;;  %v3195_v19 = vld [vmem:[#allocation36_spill] sm:$0xff]  ;;  %v3197_v15 = vld [vmem:[#allocation26_spill] sm:$0xff] }
 0x203   :  { %v1425_v23 = vmax.f32 %v3190_v56, 0.0  ;;  %v1426_v5 = vmax.f32 %v2913_v59, 0.0  ;;  %v1427_v38 = vmax.f32 %v3191_v12, 0.0  ;;  %v1428_v6 = vmax.f32 %v2916_v41, 0.0  ;;  %v3196_v56 = vld [vmem:[#allocation41_spill] sm:$0xff]  ;;  %v3198_v9 = vld [vmem:[#allocation28_spill] sm:$0xff] }
 0x204   :  { %v1429_v36 = vmax.f32 %v3192_v57, 0.0  ;;  %v1430_v3 = vmax.f32 %v2919_v58, 0.0  ;;  %v1431_v43 = vmax.f32 %v3193_v4, 0.0  ;;  %v1432_v42 = vmax.f32 %v2922_v31, 0.0  ;;  %v3199_v28 = vld [vmem:[#allocation42_spill] sm:$0xff]  ;;  %v3200_v61 = vld [vmem:[#allocation43_spill] sm:$0xff] }
 0x205   :  { %v1433_v53 = vmax.f32 %v3194_v16, 0.0  ;;  %v1434_v55 = vmax.f32 %v2925_v2, 0.0  ;;  %v1435_v0 = vmax.f32 %v3195_v19, 0.0  ;;  %v1436_v59 = vmax.f32 %v2928_v22, 0.0  ;;  %v3201_v17 = vld [vmem:[#allocation44_spill] sm:$0xff] }
 0x206   :  { %v1437_v12 = vmax.f32 %v3196_v56, 0.0  ;;  %v1438_v41 = vmax.f32 %v2931_v10, 0.0  ;;  %v1439_v57 = vmax.f32 %v3197_v15, 0.0  ;;  %v1440_v58 = vmax.f32 %v2934_v46, 0.0 }
 0x207   :  { %v1441_v4 = vmax.f32 %v3198_v9, 0.0  ;;  %v1442_v31 = vmax.f32 %v2937_v7, 0.0  ;;  %v1443_v16 = vmax.f32 %v3199_v28, 0.0  ;;  %v1444_v2 = vmax.f32 %v2940_v8, 0.0  ;;  %v3203_v9 = vld [vmem:[#allocation46_spill] sm:$0xff]  ;;  %v3204_v28 = vld [vmem:[#allocation17_spill] sm:$0xff] }
 0x208   :  { %v1445_v19 = vmax.f32 %v3200_v61, 0.0  ;;  %v1446_v22 = vmax.f32 %v2943_v24, 0.0  ;;  %v1447_v56 = vmax.f32 %v3201_v17, 0.0  ;;  %v1448_v10 = vmax.f32 %v2946_v39, 0.0  ;;  %v3205_v61 = vld [vmem:[#allocation47_spill] sm:$0xff]  ;;  %v3206_v17 = vld [vmem:[#allocation16_spill] sm:$0xff] }
 0x209   :  { %v1449_v15 = vmax.f32 %v3202_v49, 0.0  ;;  %v1450_v46 = vmax.f32 %v2949_v52, 0.0  ;;  %v1451_v7 = vmax.f32 %v3203_v9, 0.0  ;;  %v1452_v8 = vmax.f32 %v3204_v28, 0.0  ;;  %v3207_v49 = vld [vmem:[#allocation18_spill] sm:$0xff] }
 0x20a   :  { %v1453_v24 = vmax.f32 %v3205_v61, 0.0  ;;  %v1454_v39 = vmax.f32 %v3206_v17, 0.0  ;;  %v1455_v52 = vmax.f32 %v3207_v49, 0.0  ;;  %v3208_v9 = vld [vmem:[#allocation30_spill] sm:$0xff]  ;;  %v3209_v61 = vld [vmem:[#allocation19_spill] sm:$0xff]  ;;  %v3210_v49 = vld [vmem:[#allocation32_spill] sm:$0xff] }
 0x20b   :  { %v1456_v28 = vmax.f32 %v3208_v9, 0.0  ;;  %v1457_v17 = vmax.f32 %v3209_v61, 0.0  ;;  %v1458_v9 = vmax.f32 %v3210_v49, 0.0  ;;  %v1461_v61 = vpack.c.bf16 %v1398_v32, %v1397_v63 }
 0x20c   :  { %v1462_v49 = vpack.c.bf16 %v1400_v62, %v1399_v35  ;;  %v1463_v32 = vpack.c.bf16 %v1402_v13, %v1401_v27  ;;  %v1464_v63 = vpack.c.bf16 %v1404_v44, %v1403_v60  ;;  %v1465_v35 = vpack.c.bf16 %v1406_v45, %v1405_v54 }
 0x20d   :  { %v1466_v62 = vpack.c.bf16 %v1408_v21, %v1407_v29  ;;  %v1467_v13 = vpack.c.bf16 %v1410_v50, %v1409_v40  ;;  %v1468_v27 = vpack.c.bf16 %v1412_v48, %v1411_v26  ;;  %v1469_v44 = vpack.c.bf16 %v1414_v33, %v1413_v20  ;;  %1493 = vst [vmem:[#allocation11] sm:$0xff] %v1461_v61 }
 0x20e   :  { %v1470_v60 = vpack.c.bf16 %v1416_v18, %v1415_v47  ;;  %v1471_v45 = vpack.c.bf16 %v1418_v25, %v1417_v1  ;;  %v1472_v54 = vpack.c.bf16 %v1420_v14, %v1419_v34  ;;  %v1473_v21 = vpack.c.bf16 %v1422_v11, %v1421_v37  ;;  %1494 = vst [vmem:[#allocation11 + $0x8] sm:$0xff] %v1462_v49 }
 0x20f   :  { %v1474_v29 = vpack.c.bf16 %v1424_v51, %v1423_v30  ;;  %v1475_v40 = vpack.c.bf16 %v1426_v5, %v1425_v23  ;;  %v1476_v50 = vpack.c.bf16 %v1428_v6, %v1427_v38  ;;  %v1477_v26 = vpack.c.bf16 %v1430_v3, %v1429_v36  ;;  %1495 = vst [vmem:[#allocation11 + $0x10] sm:$0xff] %v1463_v32 }
 0x210   :  { %v1478_v48 = vpack.c.bf16 %v1432_v42, %v1431_v43  ;;  %v1479_v20 = vpack.c.bf16 %v1434_v55, %v1433_v53  ;;  %v1480_v33 = vpack.c.bf16 %v1436_v59, %v1435_v0  ;;  %v1481_v18 = vpack.c.bf16 %v1438_v41, %v1437_v12  ;;  %1496 = vst [vmem:[#allocation11 + $0x18] sm:$0xff] %v1464_v63 }
 0x211   :  { %v1482_v47 = vpack.c.bf16 %v1440_v58, %v1439_v57  ;;  %v1483_v61 = vpack.c.bf16 %v1442_v31, %v1441_v4  ;;  %v1484_v1 = vpack.c.bf16 %v1444_v2, %v1443_v16  ;;  %v1485_v25 = vpack.c.bf16 %v1446_v22, %v1445_v19  ;;  %1497 = vst [vmem:[#allocation11 + $0x20] sm:$0xff] %v1465_v35 }
 0x212   :  { %v1486_v14 = vpack.c.bf16 %v1448_v10, %v1447_v56  ;;  %v1487_v34 = vpack.c.bf16 %v1450_v46, %v1449_v15  ;;  %v1488_v11 = vpack.c.bf16 %v1452_v8, %v1451_v7  ;;  %v1489_v37 = vpack.c.bf16 %v1454_v39, %v1453_v24  ;;  %1498 = vst [vmem:[#allocation11 + $0x28] sm:$0xff] %v1466_v62 }
 0x213   :  { %v1490_v30 = vpack.c.bf16 %v1456_v28, %v1455_v52  ;;  %v1491_v51 = vpack.c.bf16 %v1458_v9, %v1457_v17  ;;  %1499 = vst [vmem:[#allocation11 + $0x30] sm:$0xff] %v1467_v13 }
 0x214   :  { %1500 = vst [vmem:[#allocation11 + $0x38] sm:$0xff] %v1468_v27 }
 0x215   :  { %1501 = vst [vmem:[#allocation11 + $0x40] sm:$0xff] %v1469_v44 }
 0x216   :  { %1502 = vst [vmem:[#allocation11 + $0x48] sm:$0xff] %v1470_v60 }
 0x217   :  { %1503 = vst [vmem:[#allocation11 + $0x50] sm:$0xff] %v1471_v45 }
 0x218   :  { %1504 = vst [vmem:[#allocation11 + $0x58] sm:$0xff] %v1472_v54 }
 0x219   :  { %1505 = vst [vmem:[#allocation11 + $0x60] sm:$0xff] %v1473_v21 }
 0x21a   :  { %1506 = vst [vmem:[#allocation11 + $0x68] sm:$0xff] %v1474_v29 }
 0x21b   :  { %1507 = vst [vmem:[#allocation11 + $0x70] sm:$0xff] %v1475_v40 }
 0x21c   :  { %1508 = vst [vmem:[#allocation11 + $0x78] sm:$0xff] %v1476_v50 }
 0x21d   :  { %1509 = vst [vmem:[#allocation11 + $0x80] sm:$0xff] %v1477_v26 }
 0x21e   :  { %1510 = vst [vmem:[#allocation11 + $0x88] sm:$0xff] %v1478_v48 }
 0x21f   :  { %1511 = vst [vmem:[#allocation11 + $0x90] sm:$0xff] %v1479_v20 }
 0x220   :  { %1512 = vst [vmem:[#allocation11 + $0x98] sm:$0xff] %v1480_v33 }
 0x221   :  { %1513 = vst [vmem:[#allocation11 + $0xa0] sm:$0xff] %v1481_v18 }
 0x222   :  { %1514 = vst [vmem:[#allocation11 + $0xa8] sm:$0xff] %v1482_v47 }
 0x223   :  { %1515 = vst [vmem:[#allocation11 + $0xb0] sm:$0xff] %v1483_v61 }
 0x224   :  { %1516 = vst [vmem:[#allocation11 + $0xb8] sm:$0xff] %v1484_v1 }
 0x225   :  { %1517 = vst [vmem:[#allocation11 + $0xc0] sm:$0xff] %v1485_v25 }
 0x226   :  { %1518 = vst [vmem:[#allocation11 + $0xc8] sm:$0xff] %v1486_v14 }
 0x227   :  { %1519 = vst [vmem:[#allocation11 + $0xd0] sm:$0xff] %v1487_v34 }
 0x228   :  { %1520 = vst [vmem:[#allocation11 + $0xd8] sm:$0xff] %v1488_v11 }
 0x229   :  { %1521 = vst [vmem:[#allocation11 + $0xe0] sm:$0xff] %v1489_v37 }
 0x22a   :  { %1522 = vst [vmem:[#allocation11 + $0xe8] sm:$0xff] %v1490_v30 }
 0x22b   :  { %1523 = vst [vmem:[#allocation11 + $0xf0] sm:$0xff] %v1491_v51 }
 0x22c   :  { %1537 = dma.vmem_to_hbm [thread:$0]  %s1530_s15, 4096, %s1532_s18, [#allocation5], %s1869_s26, %s1869_s26, %s1870_s27  }
 0x22d   :  { %1866 = dma.done.wait [#allocation5], 4096  }
 0x22e   :  { %1867 = vsyncadd [#allocation5], 4294963200 }
 0x22f   :  { %1542 = vsyncpa [#allocation4], 1 }
 0x230   :  { %1543 = vsyncpa [#allocation7], 1 }
 0x231   :  { %1544 = vsyncpa [#allocation10], 1 }
 0x232   :  { %1545 = vsyncpa [#allocation5], 1 }

</bundles_post_ra>
